<compile_context>
chip_gen: v7x
topology: tpu7x:2x2x1
jax: 0.10.0
libtpu: 0.0.40
codegen_flags: <defaults>
</compile_context>

<pallas_src>
from functools import partial

import jax
import jax.numpy as jnp
from jax.experimental import pallas as pl
from jax.experimental.pallas import tpu as pltpu

VMEM_SPEC = pl.BlockSpec(memory_space=pltpu.MemorySpace.VMEM)

CONV_OUT = 64  # Conv1d out channels (hard-coded in the PyTorch module)
KSIZE = 5      # Conv1d kernel size


# ---------------------------------------------------------------------------
# Kernel 1: im2col Conv1d + bias + ReLU + MaxPool1d(2, 2)
# ---------------------------------------------------------------------------
def conv_relu_pool_kernel(xc_ref, w_ref, b_ref, out_ref):
    # xc : (2*B*T, K*Cin) im2col rows; first B*T rows = even time steps, last B*T = odd,
    #      each block batch-major / time-minor.
    # w  : (K*Cin, Cout)   b: (1, Cout)   out: (B*T, Cout)
    n = out_ref.shape[0]
    y = jnp.dot(xc_ref[...], w_ref[...],
                preferred_element_type=jnp.float32) + b_ref[...]
    y = jnp.maximum(y, 0.0)                       # bias + ReLU, kept in registers
    # MaxPool1d(2, 2): max of the even-time half vs. the odd-time half
    # (contiguous, 8-aligned sublane slices -- no scratch store, no stride-2 loads).
    out_ref[...] = jnp.maximum(y[:n, :], y[n:, :])


# ---------------------------------------------------------------------------
# Kernel 2: fused bidirectional multi-layer LSTM (seq_len == 1) + fc + sigmoid
# ---------------------------------------------------------------------------
def lstm_fc_kernel(feat_ref, *refs, hidden_dim, num_layers):
    # refs = (W_0, b_0, ..., W_{L-1}, b_{L-1}, wf, bf, out)
    # W_l : (In_l, 6H) with columns [i_fwd,i_bwd | g_fwd,g_bwd | o_fwd,o_bwd]
    #       (forget gate dropped: it multiplies c0 == 0).  b_l = b_ih + b_hh, same order.
    H = hidden_dim
    out_ref = refs[-1]
    wf_ref, bf_ref = refs[-3], refs[-2]

    x = feat_ref[...]                                              # (B, In_0)
    for l in range(num_layers):
        w_ref, b_ref = refs[2 * l], refs[2 * l + 1]
        gates = jnp.dot(x.astype(w_ref.dtype), w_ref[...],         # one matmul covers
                        preferred_element_type=jnp.float32) + b_ref[...]  # both directions
        i = jax.nn.sigmoid(gates[:, 0:2 * H])
        g = jnp.tanh(gates[:, 2 * H:4 * H])
        o = jax.nn.sigmoid(gates[:, 4 * H:6 * H])
        x = o * jnp.tanh(i * g)                                    # (B, 2H) = [h_fwd | h_bwd]
    # lstm_out[:, 0, :] == x; attention softmax over the length-1 seq axis is exactly 1.0,
    # so context_vector == x (bit-exact elision of the attention branch).
    z = jnp.dot(x, wf_ref[...], preferred_element_type=jnp.float32) + bf_ref[...]
    out_ref[...] = jax.nn.sigmoid(z)


# ---------------------------------------------------------------------------
# Parameter construction (deterministic, PyTorch-like uniform fan-in init)
# ---------------------------------------------------------------------------
def init_params(key, num_channels, hidden_dim, num_layers):
    H = hidden_dim
    keys = iter(jax.random.split(key, 64))

    def u(shape, fan_in):
        s = float(fan_in) ** -0.5
        return jax.random.uniform(next(keys), shape, jnp.float32, -s, s)

    p = {}
    p["conv_w"] = u((CONV_OUT, num_channels, KSIZE), num_channels * KSIZE)
    p["conv_b"] = u((CONV_OUT,), num_channels * KSIZE)

    in_size = CONV_OUT * 64  # cnn_output_size = 64 * 64 (hard-coded in the module)
    for l in range(num_layers):
        for d in range(2):  # bidirectional
            p[f"lstm_w_ih_l{l}_d{d}"] = u((4 * H, in_size), H)
            p[f"lstm_w_hh_l{l}_d{d}"] = u((4 * H, H), H)  # unused: seq_len==1, h0==0
            p[f"lstm_b_ih_l{l}_d{d}"] = u((4 * H,), H)
            p[f"lstm_b_hh_l{l}_d{d}"] = u((4 * H,), H)
        in_size = 2 * H

    p["fc_w"] = u((1, 2 * H), 2 * H)
    p["fc_b"] = u((1,), 2 * H)
    # attention params exist in the module but are mathematically dead (softmax over a
    # length-1 axis == 1.0); created here for fidelity, never used.
    p["attn_w"] = u((1, 2 * H), 2 * H)
    p["attn_b"] = u((1,), 2 * H)
    return p


# ---------------------------------------------------------------------------
# One-time weight preparation: kernel-ready layouts (no per-call transposes)
# ---------------------------------------------------------------------------
def prepare_weights(params, *, hidden_dim, num_layers):
    H = hidden_dim
    C = CONV_OUT
    Cin = params["conv_w"].shape[1]

    prep = {}
    # Conv: (Cout, Cin, K) -> (K*Cin, Cout); rows k-major / cin-minor to match im2col cols.
    prep["conv_w"] = jnp.transpose(params["conv_w"], (2, 1, 0)).reshape(KSIZE * Cin, C)
    prep["conv_b"] = params["conv_b"].reshape(1, C)

    lstm = []
    for l in range(num_layers):
        ws, bs = [], []
        for gate in (0, 2, 3):                       # i, g, o (PyTorch order i,f,g,o); f is dead
            for d in range(2):                       # forward, backward
                w = params[f"lstm_w_ih_l{l}_d{d}"][gate * H:(gate + 1) * H]       # (H, In)
                b = (params[f"lstm_b_ih_l{l}_d{d}"]
                     + params[f"lstm_b_hh_l{l}_d{d}"])[gate * H:(gate + 1) * H]   # (H,)
                ws.append(w)
                bs.append(b)
        w6 = jnp.concatenate(ws, axis=0)             # (6H, In)
        b6 = jnp.concatenate(bs, axis=0)             # (6H,)
        if l == 0:
            # Permute input features from PyTorch's channel-major flatten (c*T + t) to the
            # kernel's natural time-major flatten (t*C + c) -- removes the runtime transpose.
            In = w6.shape[1]
            assert In % C == 0
            T = In // C
            w6 = w6.reshape(6 * H, C, T).transpose(0, 2, 1).reshape(6 * H, In)
            w_l = jnp.transpose(w6).astype(jnp.bfloat16)   # big matrix: bf16 halves the HBM DMA
        else:
            w_l = jnp.transpose(w6)                        # tiny: keep f32
        lstm.append((w_l, b6.reshape(1, 6 * H)))
    prep["lstm"] = lstm

    prep["fc_w"] = jnp.transpose(params["fc_w"])           # (2H, 1)
    prep["fc_b"] = params["fc_b"].reshape(1, 1)
    return prep


# ---------------------------------------------------------------------------
# Forward pass wrapper
# ---------------------------------------------------------------------------
def cnn_rnn_forward(x, prep, *, hidden_dim, num_layers):
    B, Cin, L = x.shape
    assert L % 2 == 0
    T = L // 2
    C = CONV_OUT
    assert C * T == prep["lstm"][0][0].shape[0], "L must satisfy 64*(L//2) == cnn_output_size"

    # im2col built in the wrapper (input is only a few KB of plain XLA work):
    # rows = [even time steps | odd time steps], each block batch-major / time-minor;
    # columns = k-major / cin-minor.
    x_nlc = jnp.transpose(x, (0, 2, 1))                              # (B, L, Cin)
    x_pad = jnp.pad(x_nlc, ((0, 0), (KSIZE // 2, KSIZE // 2), (0, 0)))
    cols = jnp.concatenate([x_pad[:, k:k + L, :] for k in range(KSIZE)], axis=-1)  # (B, L, K*Cin)
    even = cols[:, 0::2, :].reshape(B * T, KSIZE * Cin)
    odd = cols[:, 1::2, :].reshape(B * T, KSIZE * Cin)
    xc = jnp.concatenate([even, odd], axis=0)                        # (2*B*T, K*Cin)

    pooled = pl.pallas_call(
        conv_relu_pool_kernel,
        out_shape=jax.ShapeDtypeStruct((B * T, C), jnp.float32),
        in_specs=[VMEM_SPEC] * 3,
        out_specs=VMEM_SPEC,
    )(xc, prep["conv_w"], prep["conv_b"])

    # (B*T, C) and (B, T*C) are the same row-major HBM bytes: free metadata reshape,
    # no transpose (layer-0 weight rows were permuted to time-major order at prep time).
    feat = pooled.reshape(B, T * C)

    flat_w = []
    for w_l, b_l in prep["lstm"]:
        flat_w += [w_l, b_l]

    out = pl.pallas_call(
        partial(lstm_fc_kernel, hidden_dim=hidden_dim, num_layers=num_layers),
        out_shape=jax.ShapeDtypeStruct((B, 1), jnp.float32),
        in_specs=[VMEM_SPEC] * (1 + len(flat_w) + 2),
        out_specs=VMEM_SPEC,
    )(feat, *flat_w, prep["fc_w"], prep["fc_b"])
    return out


if __name__ == "__main__":
    # L = 128 -> pool to 64 steps -> 64 channels * 64 steps = 4096, matching the module's
    # hard-coded cnn_output_size.
    B, Cin, L = 2, 4, 128
    hidden_dim, num_layers = 32, 2

    key = jax.random.PRNGKey(0)
    kx, kp = jax.random.split(key)
    x = jax.random.normal(kx, (B, Cin, L), jnp.float32)   # PyTorch NCW input layout
    params = init_params(kp, Cin, hidden_dim, num_layers)
    prep = prepare_weights(params, hidden_dim=hidden_dim, num_layers=num_layers)  # one-time

    fwd = jax.jit(partial(cnn_rnn_forward, hidden_dim=hidden_dim, num_layers=num_layers))
    out = fwd(x, prep)
    jax.block_until_ready(out)

    assert out.shape == (B, 1), out.shape
    assert bool(jnp.all(jnp.isfinite(out)))
    assert bool(jnp.all((out >= 0.0) & (out <= 1.0)))  # sigmoid output range
    print("KERNEL_OK")
</pallas_src>

<mosaic_0001>
module attributes {stable_mosaic.version = 11 : i64} {
  func.func @conv_relu_pool_kernel(%arg0: memref<256x20xf32, #tpu.memory_space<vmem>>, %arg1: memref<20x64xf32, #tpu.memory_space<vmem>>, %arg2: memref<1x64xf32, #tpu.memory_space<vmem>>, %arg3: memref<128x64xf32, #tpu.memory_space<vmem>>) attributes {dimension_semantics = [], scalar_prefetch = 0 : i64, scratch_operands = 0 : i64, tpu.core_type = #tpu.core_type<tc>} {
    %c0 = arith.constant 0 : index
    %c0_0 = arith.constant 0 : index
    %0 = vector.load %arg0[%c0, %c0_0] : memref<256x20xf32, #tpu.memory_space<vmem>>, vector<256x20xf32>
    %c0_1 = arith.constant 0 : index
    %c0_2 = arith.constant 0 : index
    %1 = vector.load %arg1[%c0_1, %c0_2] : memref<20x64xf32, #tpu.memory_space<vmem>>, vector<20x64xf32>
    %cst = arith.constant dense<0.000000e+00> : vector<256x64xf32>
    %2 = tpu.matmul %0, %1, %cst {dimension_numbers = #tpu.dot_dimension_numbers<[1], [0], [0], [1], [0, 0, 1, 1], [], []>} : vector<256x20xf32>, vector<20x64xf32>, vector<256x64xf32> -> vector<256x64xf32>
    %c0_3 = arith.constant 0 : index
    %c0_4 = arith.constant 0 : index
    %3 = vector.load %arg2[%c0_3, %c0_4] : memref<1x64xf32, #tpu.memory_space<vmem>>, vector<1x64xf32>
    %4 = vector.broadcast %3 : vector<1x64xf32> to vector<256x64xf32>
    %5 = arith.addf %2, %4 : vector<256x64xf32>
    %cst_5 = arith.constant 0.000000e+00 : f32
    %6 = vector.broadcast %cst_5 : f32 to vector<256x64xf32>
    %7 = arith.maximumf %5, %6 : vector<256x64xf32>
    %8 = vector.extract_strided_slice %7 {offsets = [0, 0], sizes = [128, 64], strides = [1, 1]} : vector<256x64xf32> to vector<128x64xf32>
    %9 = vector.extract_strided_slice %7 {offsets = [128, 0], sizes = [128, 64], strides = [1, 1]} : vector<256x64xf32> to vector<128x64xf32>
    %10 = arith.maximumf %8, %9 : vector<128x64xf32>
    %c0_6 = arith.constant 0 : index
    %c0_7 = arith.constant 0 : index
    %11 = vector.load %arg3[%c0_6, %c0_7] : memref<128x64xf32, #tpu.memory_space<vmem>>, vector<128x64xf32>
    tpu.vector_store %arg3[%c0_6, %c0_7], %10 {strides = array<i32>} : memref<128x64xf32, #tpu.memory_space<vmem>>, vector<128x64xf32>,
    return
  }
}

module attributes {stable_mosaic.version = 11 : i64} {
  func.func @lstm_fc_kernel(%arg0: memref<2x4096xf32, #tpu.memory_space<vmem>>, %arg1: memref<4096x192xbf16, #tpu.memory_space<vmem>>, %arg2: memref<1x192xf32, #tpu.memory_space<vmem>>, %arg3: memref<64x192xf32, #tpu.memory_space<vmem>>, %arg4: memref<1x192xf32, #tpu.memory_space<vmem>>, %arg5: memref<64x1xf32, #tpu.memory_space<vmem>>, %arg6: memref<1x1xf32, #tpu.memory_space<vmem>>, %arg7: memref<2x1xf32, #tpu.memory_space<vmem>>) attributes {dimension_semantics = [], scalar_prefetch = 0 : i64, scratch_operands = 0 : i64, tpu.core_type = #tpu.core_type<tc>} {
    %c0 = arith.constant 0 : index
    %c0_0 = arith.constant 0 : index
    %0 = vector.load %arg0[%c0, %c0_0] : memref<2x4096xf32, #tpu.memory_space<vmem>>, vector<2x4096xf32>
    %1 = arith.truncf %0 : vector<2x4096xf32> to vector<2x4096xbf16>
    %c0_1 = arith.constant 0 : index
    %c0_2 = arith.constant 0 : index
    %2 = vector.load %arg1[%c0_1, %c0_2] : memref<4096x192xbf16, #tpu.memory_space<vmem>>, vector<4096x192xbf16>
    %cst = arith.constant dense<0.000000e+00> : vector<2x192xf32>
    %3 = tpu.matmul %1, %2, %cst {dimension_numbers = #tpu.dot_dimension_numbers<[1], [0], [0], [1], [0, 0, 1, 1], [], []>} : vector<2x4096xbf16>, vector<4096x192xbf16>, vector<2x192xf32> -> vector<2x192xf32>
    %c0_3 = arith.constant 0 : index
    %c0_4 = arith.constant 0 : index
    %4 = vector.load %arg2[%c0_3, %c0_4] : memref<1x192xf32, #tpu.memory_space<vmem>>, vector<1x192xf32>
    %5 = vector.broadcast %4 : vector<1x192xf32> to vector<2x192xf32>
    %6 = arith.addf %3, %5 : vector<2x192xf32>
    %7 = vector.extract_strided_slice %6 {offsets = [0, 0], sizes = [2, 64], strides = [1, 1]} : vector<2x192xf32> to vector<2x64xf32>
    %8 = arith.negf %7 : vector<2x64xf32>
    %9 = math.exp %8 : vector<2x64xf32>
    %cst_5 = arith.constant 1.000000e+00 : f32
    %10 = vector.broadcast %cst_5 : f32 to vector<2x64xf32>
    %11 = arith.addf %10, %9 : vector<2x64xf32>
    %12 = arith.divf %10, %11 : vector<2x64xf32>
    %13 = vector.extract_strided_slice %6 {offsets = [0, 64], sizes = [2, 64], strides = [1, 1]} : vector<2x192xf32> to vector<2x64xf32>
    %14 = math.tanh %13 : vector<2x64xf32>
    %15 = vector.extract_strided_slice %6 {offsets = [0, 128], sizes = [2, 64], strides = [1, 1]} : vector<2x192xf32> to vector<2x64xf32>
    %16 = arith.negf %15 : vector<2x64xf32>
    %17 = math.exp %16 : vector<2x64xf32>
    %cst_6 = arith.constant 1.000000e+00 : f32
    %18 = vector.broadcast %cst_6 : f32 to vector<2x64xf32>
    %19 = arith.addf %18, %17 : vector<2x64xf32>
    %20 = arith.divf %18, %19 : vector<2x64xf32>
    %21 = arith.mulf %12, %14 : vector<2x64xf32>
    %22 = math.tanh %21 : vector<2x64xf32>
    %23 = arith.mulf %20, %22 : vector<2x64xf32>
    %c0_7 = arith.constant 0 : index
    %c0_8 = arith.constant 0 : index
    %24 = vector.load %arg3[%c0_7, %c0_8] : memref<64x192xf32, #tpu.memory_space<vmem>>, vector<64x192xf32>
    %cst_9 = arith.constant dense<0.000000e+00> : vector<2x192xf32>
    %25 = tpu.matmul %23, %24, %cst_9 {dimension_numbers = #tpu.dot_dimension_numbers<[1], [0], [0], [1], [0, 0, 1, 1], [], []>} : vector<2x64xf32>, vector<64x192xf32>, vector<2x192xf32> -> vector<2x192xf32>
    %c0_10 = arith.constant 0 : index
    %c0_11 = arith.constant 0 : index
    %26 = vector.load %arg4[%c0_10, %c0_11] : memref<1x192xf32, #tpu.memory_space<vmem>>, vector<1x192xf32>
    %27 = vector.broadcast %26 : vector<1x192xf32> to vector<2x192xf32>
    %28 = arith.addf %25, %27 : vector<2x192xf32>
    %29 = vector.extract_strided_slice %28 {offsets = [0, 0], sizes = [2, 64], strides = [1, 1]} : vector<2x192xf32> to vector<2x64xf32>
    %30 = arith.negf %29 : vector<2x64xf32>
    %31 = math.exp %30 : vector<2x64xf32>
    %cst_12 = arith.constant 1.000000e+00 : f32
    %32 = vector.broadcast %cst_12 : f32 to vector<2x64xf32>
    %33 = arith.addf %32, %31 : vector<2x64xf32>
    %34 = arith.divf %32, %33 : vector<2x64xf32>
    %35 = vector.extract_strided_slice %28 {offsets = [0, 64], sizes = [2, 64], strides = [1, 1]} : vector<2x192xf32> to vector<2x64xf32>
    %36 = math.tanh %35 : vector<2x64xf32>
    %37 = vector.extract_strided_slice %28 {offsets = [0, 128], sizes = [2, 64], strides = [1, 1]} : vector<2x192xf32> to vector<2x64xf32>
    %38 = arith.negf %37 : vector<2x64xf32>
    %39 = math.exp %38 : vector<2x64xf32>
    %cst_13 = arith.constant 1.000000e+00 : f32
    %40 = vector.broadcast %cst_13 : f32 to vector<2x64xf32>
    %41 = arith.addf %40, %39 : vector<2x64xf32>
    %42 = arith.divf %40, %41 : vector<2x64xf32>
    %43 = arith.mulf %34, %36 : vector<2x64xf32>
    %44 = math.tanh %43 : vector<2x64xf32>
    %45 = arith.mulf %42, %44 : vector<2x64xf32>
    %c0_14 = arith.constant 0 : index
    %c0_15 = arith.constant 0 : index
    %46 = vector.load %arg5[%c0_14, %c0_15] : memref<64x1xf32, #tpu.memory_space<vmem>>, vector<64x1xf32>
    %cst_16 = arith.constant dense<0.000000e+00> : vector<2x1xf32>
    %47 = tpu.matmul %45, %46, %cst_16 {dimension_numbers = #tpu.dot_dimension_numbers<[1], [0], [0], [1], [0, 0, 1, 1], [], []>} : vector<2x64xf32>, vector<64x1xf32>, vector<2x1xf32> -> vector<2x1xf32>
    %c0_17 = arith.constant 0 : index
    %c0_18 = arith.constant 0 : index
    %48 = vector.load %arg6[%c0_17, %c0_18] : memref<1x1xf32, #tpu.memory_space<vmem>>, vector<1x1xf32>
    %49 = vector.broadcast %48 : vector<1x1xf32> to vector<2x1xf32>
    %50 = arith.addf %47, %49 : vector<2x1xf32>
    %51 = arith.negf %50 : vector<2x1xf32>
    %52 = math.exp %51 : vector<2x1xf32>
    %cst_19 = arith.constant 1.000000e+00 : f32
    %53 = vector.broadcast %cst_19 : f32 to vector<2x1xf32>
    %54 = arith.addf %53, %52 : vector<2x1xf32>
    %55 = arith.divf %53, %54 : vector<2x1xf32>
    %c0_20 = arith.constant 0 : index
    %c0_21 = arith.constant 0 : index
    %56 = vector.load %arg7[%c0_20, %c0_21] : memref<2x1xf32, #tpu.memory_space<vmem>>, vector<2x1xf32>
    tpu.vector_store %arg7[%c0_20, %c0_21], %55 {strides = array<i32>} : memref<2x1xf32, #tpu.memory_space<vmem>>, vector<2x1xf32>,
    return
  }
}

</mosaic_0001>

<bundles_post_ra>
// kernel: cnn_rnn_forward.2
= control target key start
LH: loop header
LB: loop body
LE: loop exit
PB: predicated region body
PF: predicated region fallthrough
CT: control target
= control target key end

     0   :  { %8 = vsyncpa [#allocation3], 0  ;;  %s936_s0 = inlined_call_operand.vmem [shape: f32[256,20], index: 0, kind: input, shape index: {}]   ;;  %s937_s1 = inlined_call_operand.hbm [shape: f32[20,64], index: 1, kind: input, shape index: {}]   ;;  %s938_s2 = inlined_call_operand.hbm [shape: f32[1,64], index: 2, kind: input, shape index: {}]   ;;  %s939_s3 = inlined_call_operand.vmem [shape: f32[128,64], index: 3, kind: output, shape index: {}]  }
   0x1   :  { %9 = vsyncpa [#allocation5], 0  ;;  %s662_s12 = smov [#allocation2]   ;;  %s614_s16 = scalar_lea.hbm %s937_s1, 384 }
   0x2   :  { %s17_s13 = sshll.u32 %s662_s12, 4  ;;  %p615_p0 = scmp.ne.s32.totalorder %s937_s1, %s614_s16  ;;  %s18_s13 = int_to_ptr.vmem [resolvable:$true] %s17_s13 }
   0x3   :  { %p618_p1 = scmp.lt.u32.totalorder %s614_s16, %s937_s1 }
   0x5   :  { %p620_p2 = pnand %p618_p1, %p615_p0 }
   0x7   :  { %623 = shalt.err (!%p620_p2)
}
   0x8   :  { %s624_s21 = scalar_lea.vmem %s18_s13, 384  ;;  %p629_p4 = scmp.lt.s32.totalorder %s18_s13, %s18_s13 }
   0x9   :  { %p625_p3 = scmp.ne.s32.totalorder %s18_s13, %s624_s21  ;;  %p630_p5 = scmp.lt.s32.totalorder %s624_s21, %s624_s21 }
   0xb   :  { %p631_p6 = por %p630_p5, %p629_p4 }
   0xd   :  { %p632_p7 = pnand %p631_p6, %p625_p3 }
   0xf   :  { %635 = shalt.err (!%p632_p7)
}
  0x10   :  { %s663_s22 = smov 128   ;;  %s664_s23 = smov 8  }
  0x11   :  { %23 = dma.hbm_to_vmem [thread:$0]  %s937_s1, 384, %s18_s13, [#allocation3], %s663_s22, %s663_s22, %s664_s23  }
  0x12   :  { %s665_s26 = smov [#allocation4]   ;;  %s636_s30 = scalar_lea.hbm %s938_s2, 16 }
  0x13   :  { %s30_s27 = sshll.u32 %s665_s26, 4  ;;  %p637_p8 = scmp.ne.s32.totalorder %s938_s2, %s636_s30  ;;  %s31_s27 = int_to_ptr.vmem [resolvable:$true] %s30_s27 }
  0x14   :  { %p640_p9 = scmp.lt.u32.totalorder %s636_s30, %s938_s2 }
  0x16   :  { %p642_p10 = pnand %p640_p9, %p637_p8 }
  0x18   :  { %645 = shalt.err (!%p642_p10)
}
  0x19   :  { %s646_s8 = scalar_lea.vmem %s31_s27, 16  ;;  %s650_s1 = scalar_lea.vmem %s31_s27, 32 }
  0x1a   :  { %p647_p11 = scmp.ne.s32.totalorder %s31_s27, %s646_s8  ;;  %p651_p12 = scmp.lt.s32.totalorder %s31_s27, %s31_s27 }
  0x1b   :  { %p652_p13 = scmp.lt.s32.totalorder %s650_s1, %s646_s8 }
  0x1d   :  { %p653_p0 = por %p652_p13, %p651_p12 }
  0x1f   :  { %p654_p1 = pnand %p653_p0, %p647_p11 }
  0x21   :  { %657 = shalt.err (!%p654_p1)
}
  0x22   :  { %33 = dma.hbm_to_vmem [thread:$0]  %s938_s2, 16, %s31_s27, [#allocation5]  }
  0x23   :  { %658 = dma.done.wait [#allocation3], 384  }
  0x24   :  { %659 = vsyncadd [#allocation3], 4294966912 }
  0x25   :  { %660 = dma.done.wait [#allocation5], 16  }
  0x26   :  { %661 = vsyncadd [#allocation5], 4294967280  ;;  %vm82_vm0 = vcmask 162816   ;;  %v72_v0 = vld [vmem:[#allocation2] sm:$0xff]  ;;  %v73_v1 = vld [vmem:[#allocation2 + $0x8] sm:$0xff]  ;;  %vm179_vm1 = vcmask 1043456  }
  0x27   :  { %v602_v2 = vpack.c.bf16 %v73_v1, %v72_v0  ;;  %v40_v3 = vld [vmem:[%s936_s0] sm:$0xff]  ;;  %v74_v5 = vld [vmem:[#allocation2 + $0x10] sm:$0xf]  ;;  %v41_v6 = vld [vmem:[%s936_s0 + $0x8] sm:$0xff]  ;;  %vm456_vm2 = vcmask 523264  }
  0x28   :  { %v56_v4 = vld [vmem:[%s936_s0 + $0x80] sm:$0xff]  ;;  %554 = vmatprep.mubr.msk.f32.mxu0 %vm82_vm0, %v40_v3  ;;  %v57_v7 = vld [vmem:[%s936_s0 + $0x88] sm:$0xff]  ;;  %v42_v8 = vld [vmem:[%s936_s0 + $0x10] sm:$0xff] }
  0x29   :  { %578 = vmatprep.mubr.msk.f32.mxu1 %vm82_vm0, %v56_v4  ;;  %603 = vmatprep.subr.bf16.mxu0 %v602_v2  ;;  %v58_v9 = vld [vmem:[%s936_s0 + $0x90] sm:$0xff]  ;;  %v43_v10 = vld [vmem:[%s936_s0 + $0x18] sm:$0xff]  ;;  %v44_v12 = vld [vmem:[%s936_s0 + $0x20] sm:$0xff] }
  0x2a   :  { %606 = vmatprep.subr.bf16.mxu1 %v602_v2  ;;  %605 = vmatpush3.bf16.msra.mxu0 %v602_v2  ;;  %v59_v11 = vld [vmem:[%s936_s0 + $0x98] sm:$0xff]  ;;  %v60_v13 = vld [vmem:[%s936_s0 + $0xa0] sm:$0xff]  ;;  %v45_v14 = vld [vmem:[%s936_s0 + $0x28] sm:$0xff] }
  0x2b   :  { %608 = vmatpush3.bf16.msra.mxu1 %v602_v2  ;;  %552 = vmatprep.subr.msk.mxu0 %vm179_vm1, %v74_v5  ;;  %v61_v15 = vld [vmem:[%s936_s0 + $0xa8] sm:$0xff]  ;;  %v46_v16 = vld [vmem:[%s936_s0 + $0x30] sm:$0xff]  ;;  %v47_v18 = vld [vmem:[%s936_s0 + $0x38] sm:$0xff] }
  0x2c   :  { %607 = vmatprep.subr.msk.mxu1 %vm179_vm1, %v74_v5  ;;  %v62_v17 = vld [vmem:[%s936_s0 + $0xb0] sm:$0xff]  ;;  %v63_v19 = vld [vmem:[%s936_s0 + $0xb8] sm:$0xff]  ;;  %v48_v20 = vld [vmem:[%s936_s0 + $0x40] sm:$0xff] }
  0x2d   :  { %v64_v21 = vld [vmem:[%s936_s0 + $0xc0] sm:$0xff]  ;;  %v49_v22 = vld [vmem:[%s936_s0 + $0x48] sm:$0xff]  ;;  %v50_v24 = vld [vmem:[%s936_s0 + $0x50] sm:$0xff] }
  0x2e   :  { %553 = vmatpush3.msk.msra.mxu0 %vm179_vm1, %v74_v5  ;;  %v65_v23 = vld [vmem:[%s936_s0 + $0xc8] sm:$0xff]  ;;  %v66_v25 = vld [vmem:[%s936_s0 + $0xd0] sm:$0xff]  ;;  %v51_v26 = vld [vmem:[%s936_s0 + $0x58] sm:$0xff] }
  0x2f   :  { %609 = vmatpush3.msk.msra.mxu1 %vm179_vm1, %v74_v5  ;;  %555 = vmatmul.mubr.msk.f32.vlgmr.msra.gmra.mrb[0].mxu0 %vm82_vm0, %v41_v6  ;;  %v67_v27 = vld [vmem:[%s936_s0 + $0xd8] sm:$0xff]  ;;  %v52_v28 = vld [vmem:[%s936_s0 + $0x60] sm:$0xff]  ;;  %v53_v30 = vld [vmem:[%s936_s0 + $0x68] sm:$0xff] }
  0x30   :  { %579 = vmatmul.mubr.msk.f32.vlgmr.msra.gmra.mrb[0].mxu1 %vm82_vm0, %v57_v7  ;;  %557 = vmatprep.mubr.msk.f32.mxu0 %vm82_vm0, %v42_v8  ;;  %v68_v29 = vld [vmem:[%s936_s0 + $0xe0] sm:$0xff]  ;;  %v69_v31 = vld [vmem:[%s936_s0 + $0xe8] sm:$0xff]  ;;  %v54_v32 = vld [vmem:[%s936_s0 + $0x70] sm:$0xff] }
  0x31   :  { %581 = vmatprep.mubr.msk.f32.mxu1 %vm82_vm0, %v58_v9  ;;  %v70_v33 = vld [vmem:[%s936_s0 + $0xf0] sm:$0xff]  ;;  %v55_v34 = vld [vmem:[%s936_s0 + $0x78] sm:$0xff] }
  0x32   :  { %v71_v35 = vld [vmem:[%s936_s0 + $0xf8] sm:$0xff] }
  0x33   :  { %558 = vmatmul.mubr.msk.f32.gmra.mrb[2].mxu0 %vm82_vm0, %v43_v10  ;;  %v838_v36 = vld [vmem:[#allocation4] ss:$0 sm:$0xff] }
  0x34   :  { %582 = vmatmul.mubr.msk.f32.gmra.mrb[2].mxu1 %vm82_vm0, %v59_v11  ;;  %560 = vmatprep.mubr.msk.f32.mxu0 %vm82_vm0, %v44_v12 }
  0x35   :  { %584 = vmatprep.mubr.msk.f32.mxu1 %vm82_vm0, %v60_v13 }
  0x37   :  { %561 = vmatmul.mubr.msk.f32.gmra.mrb[4].mxu0 %vm82_vm0, %v45_v14 }
  0x38   :  { %585 = vmatmul.mubr.msk.f32.gmra.mrb[4].mxu1 %vm82_vm0, %v61_v15  ;;  %563 = vmatprep.mubr.msk.f32.mxu0 %vm82_vm0, %v46_v16 }
  0x39   :  { %587 = vmatprep.mubr.msk.f32.mxu1 %vm82_vm0, %v62_v17 }
  0x3b   :  { %564 = vmatmul.mubr.msk.f32.gmra.mrb[6].mxu0 %vm82_vm0, %v47_v18 }
  0x3c   :  { %588 = vmatmul.mubr.msk.f32.gmra.mrb[6].mxu1 %vm82_vm0, %v63_v19  ;;  %566 = vmatprep.mubr.msk.f32.mxu0 %vm82_vm0, %v48_v20 }
  0x3d   :  { %590 = vmatprep.mubr.msk.f32.mxu1 %vm82_vm0, %v64_v21 }
  0x3f   :  { %567 = vmatmul.mubr.msk.f32.gmra.mrb[8].mxu0 %vm82_vm0, %v49_v22 }
  0x40   :  { %591 = vmatmul.mubr.msk.f32.gmra.mrb[8].mxu1 %vm82_vm0, %v65_v23  ;;  %569 = vmatprep.mubr.msk.f32.mxu0 %vm82_vm0, %v50_v24 }
  0x41   :  { %593 = vmatprep.mubr.msk.f32.mxu1 %vm82_vm0, %v66_v25 }
  0x43   :  { %570 = vmatmul.mubr.msk.f32.gmra.mrb[10].mxu0 %vm82_vm0, %v51_v26 }
  0x44   :  { %594 = vmatmul.mubr.msk.f32.gmra.mrb[10].mxu1 %vm82_vm0, %v67_v27  ;;  %572 = vmatprep.mubr.msk.f32.mxu0 %vm82_vm0, %v52_v28 }
  0x45   :  { %596 = vmatprep.mubr.msk.f32.mxu1 %vm82_vm0, %v68_v29 }
  0x47   :  { %573 = vmatmul.mubr.msk.f32.gmra.mrb[12].mxu0 %vm82_vm0, %v53_v30 }
  0x48   :  { %597 = vmatmul.mubr.msk.f32.gmra.mrb[12].mxu1 %vm82_vm0, %v69_v31  ;;  %575 = vmatprep.mubr.msk.f32.mxu0 %vm82_vm0, %v54_v32 }
  0x49   :  { %599 = vmatprep.mubr.msk.f32.mxu1 %vm82_vm0, %v70_v33 }
  0x4b   :  { %576 = vmatmul.mubr.msk.f32.gmra.mrb[14].mxu0 %vm82_vm0, %v55_v34 }
  0x4c   :  { %600 = vmatmul.mubr.msk.f32.gmra.mrb[14].mxu1 %vm82_vm0, %v71_v35 }
 0x102   :  { %v556_v37 = vpop.f32.mrb[0].mxu0 }
 0x103   :  { %v580_v38 = vpop.f32.mrb[0].mxu1  ;;  %v255_v39 = vadd.f32 %v556_v37, %v838_v36  ;;  %v249_v41 = vpop.f32.mrb[1].mxu0 }
 0x104   :  { %v335_v40 = vadd.f32 %v580_v38, %v838_v36  ;;  %v329_v42 = vpop.f32.mrb[1].mxu1  ;;  %v250_v43 = vadd.f32 %v838_v36, %v249_v41 }
 0x105   :  { %v330_v44 = vadd.f32 %v838_v36, %v329_v42  ;;  %v409_v45 = vmax.f32 %v255_v39, 0.0 }
 0x106   :  { %v425_v46 = vmax.f32 %v335_v40, 0.0  ;;  %v408_v47 = vmax.f32 %v250_v43, 0.0  ;;  %v559_v49 = vpop.f32.mrb[2].mxu0 }
 0x107   :  { %v424_v48 = vmax.f32 %v330_v44, 0.0  ;;  %v583_v50 = vpop.f32.mrb[2].mxu1  ;;  %v265_v52 = vadd.f32 %v559_v49, %v838_v36  ;;  %v259_v54 = vpop.f32.mrb[3].mxu0 }
 0x108   :  { %v441_v51 = vmax.f32 %v409_v45, %v425_v46  ;;  %v345_v53 = vadd.f32 %v583_v50, %v838_v36  ;;  %v339_v55 = vpop.f32.mrb[3].mxu1  ;;  %v260_v57 = vadd.f32 %v838_v36, %v259_v54 }
 0x109   :  { %v440_v56 = vmax.f32 %v408_v47, %v424_v48  ;;  %v340_v58 = vadd.f32 %v838_v36, %v339_v55  ;;  %v411_v59 = vmax.f32 %v265_v52, 0.0 }
 0x10a   :  { %458 = vst.msk [vmem:[%s939_s3 + $0x8] sm:$0xff] %vm456_vm2, %v441_v51  ;;  %v427_v60 = vmax.f32 %v345_v53, 0.0  ;;  %v410_v61 = vmax.f32 %v260_v57, 0.0  ;;  %v562_v63 = vpop.f32.mrb[4].mxu0 }
 0x10b   :  { %457 = vst.msk [vmem:[%s939_s3] sm:$0xff] %vm456_vm2, %v440_v56  ;;  %v426_v62 = vmax.f32 %v340_v58, 0.0  ;;  %v586_v0 = vpop.f32.mrb[4].mxu1  ;;  %v275_v2 = vadd.f32 %v562_v63, %v838_v36  ;;  %v269_v4 = vpop.f32.mrb[5].mxu0 }
 0x10c   :  { %v443_v1 = vmax.f32 %v411_v59, %v427_v60  ;;  %v355_v3 = vadd.f32 %v586_v0, %v838_v36  ;;  %v349_v5 = vpop.f32.mrb[5].mxu1  ;;  %v270_v7 = vadd.f32 %v838_v36, %v269_v4 }
 0x10d   :  { %v442_v6 = vmax.f32 %v410_v61, %v426_v62  ;;  %v350_v8 = vadd.f32 %v838_v36, %v349_v5  ;;  %v413_v9 = vmax.f32 %v275_v2, 0.0 }
 0x10e   :  { %460 = vst.msk [vmem:[%s939_s3 + $0x18] sm:$0xff] %vm456_vm2, %v443_v1  ;;  %v429_v10 = vmax.f32 %v355_v3, 0.0  ;;  %v412_v11 = vmax.f32 %v270_v7, 0.0  ;;  %v565_v13 = vpop.f32.mrb[6].mxu0 }
 0x10f   :  { %459 = vst.msk [vmem:[%s939_s3 + $0x10] sm:$0xff] %vm456_vm2, %v442_v6  ;;  %v428_v12 = vmax.f32 %v350_v8, 0.0  ;;  %v589_v14 = vpop.f32.mrb[6].mxu1  ;;  %v285_v16 = vadd.f32 %v565_v13, %v838_v36  ;;  %v279_v18 = vpop.f32.mrb[7].mxu0 }
 0x110   :  { %v445_v15 = vmax.f32 %v413_v9, %v429_v10  ;;  %v365_v17 = vadd.f32 %v589_v14, %v838_v36  ;;  %v359_v19 = vpop.f32.mrb[7].mxu1  ;;  %v280_v21 = vadd.f32 %v838_v36, %v279_v18 }
 0x111   :  { %v444_v20 = vmax.f32 %v412_v11, %v428_v12  ;;  %v360_v22 = vadd.f32 %v838_v36, %v359_v19  ;;  %v415_v23 = vmax.f32 %v285_v16, 0.0 }
 0x112   :  { %462 = vst.msk [vmem:[%s939_s3 + $0x28] sm:$0xff] %vm456_vm2, %v445_v15  ;;  %v431_v24 = vmax.f32 %v365_v17, 0.0  ;;  %v414_v25 = vmax.f32 %v280_v21, 0.0  ;;  %v568_v27 = vpop.f32.mrb[8].mxu0 }
 0x113   :  { %461 = vst.msk [vmem:[%s939_s3 + $0x20] sm:$0xff] %vm456_vm2, %v444_v20  ;;  %v430_v26 = vmax.f32 %v360_v22, 0.0  ;;  %v592_v28 = vpop.f32.mrb[8].mxu1  ;;  %v295_v30 = vadd.f32 %v568_v27, %v838_v36  ;;  %v289_v32 = vpop.f32.mrb[9].mxu0 }
 0x114   :  { %v447_v29 = vmax.f32 %v415_v23, %v431_v24  ;;  %v375_v31 = vadd.f32 %v592_v28, %v838_v36  ;;  %v369_v33 = vpop.f32.mrb[9].mxu1  ;;  %v290_v35 = vadd.f32 %v838_v36, %v289_v32 }
 0x115   :  { %v446_v34 = vmax.f32 %v414_v25, %v430_v26  ;;  %v370_v37 = vadd.f32 %v838_v36, %v369_v33  ;;  %v417_v38 = vmax.f32 %v295_v30, 0.0 }
 0x116   :  { %464 = vst.msk [vmem:[%s939_s3 + $0x38] sm:$0xff] %vm456_vm2, %v447_v29  ;;  %v433_v39 = vmax.f32 %v375_v31, 0.0  ;;  %v416_v40 = vmax.f32 %v290_v35, 0.0  ;;  %v571_v42 = vpop.f32.mrb[10].mxu0 }
 0x117   :  { %463 = vst.msk [vmem:[%s939_s3 + $0x30] sm:$0xff] %vm456_vm2, %v446_v34  ;;  %v432_v41 = vmax.f32 %v370_v37, 0.0  ;;  %v595_v43 = vpop.f32.mrb[10].mxu1  ;;  %v305_v45 = vadd.f32 %v571_v42, %v838_v36  ;;  %v299_v47 = vpop.f32.mrb[11].mxu0 }
 0x118   :  { %v449_v44 = vmax.f32 %v417_v38, %v433_v39  ;;  %v385_v46 = vadd.f32 %v595_v43, %v838_v36  ;;  %v379_v48 = vpop.f32.mrb[11].mxu1  ;;  %v300_v50 = vadd.f32 %v838_v36, %v299_v47 }
 0x119   :  { %v448_v49 = vmax.f32 %v416_v40, %v432_v41  ;;  %v380_v51 = vadd.f32 %v838_v36, %v379_v48  ;;  %v419_v52 = vmax.f32 %v305_v45, 0.0 }
 0x11a   :  { %466 = vst.msk [vmem:[%s939_s3 + $0x48] sm:$0xff] %vm456_vm2, %v449_v44  ;;  %v435_v53 = vmax.f32 %v385_v46, 0.0  ;;  %v418_v54 = vmax.f32 %v300_v50, 0.0  ;;  %v574_v56 = vpop.f32.mrb[12].mxu0 }
 0x11b   :  { %465 = vst.msk [vmem:[%s939_s3 + $0x40] sm:$0xff] %vm456_vm2, %v448_v49  ;;  %v434_v55 = vmax.f32 %v380_v51, 0.0  ;;  %v598_v57 = vpop.f32.mrb[12].mxu1  ;;  %v315_v59 = vadd.f32 %v574_v56, %v838_v36  ;;  %v309_v61 = vpop.f32.mrb[13].mxu0 }
 0x11c   :  { %v451_v58 = vmax.f32 %v419_v52, %v435_v53  ;;  %v395_v60 = vadd.f32 %v598_v57, %v838_v36  ;;  %v389_v62 = vpop.f32.mrb[13].mxu1  ;;  %v310_v0 = vadd.f32 %v838_v36, %v309_v61 }
 0x11d   :  { %v450_v63 = vmax.f32 %v418_v54, %v434_v55  ;;  %v390_v1 = vadd.f32 %v838_v36, %v389_v62  ;;  %v421_v2 = vmax.f32 %v315_v59, 0.0 }
 0x11e   :  { %468 = vst.msk [vmem:[%s939_s3 + $0x58] sm:$0xff] %vm456_vm2, %v451_v58  ;;  %v437_v3 = vmax.f32 %v395_v60, 0.0  ;;  %v420_v4 = vmax.f32 %v310_v0, 0.0  ;;  %v577_v6 = vpop.f32.mrb[14].mxu0 }
 0x11f   :  { %467 = vst.msk [vmem:[%s939_s3 + $0x50] sm:$0xff] %vm456_vm2, %v450_v63  ;;  %v436_v5 = vmax.f32 %v390_v1, 0.0  ;;  %v601_v7 = vpop.f32.mrb[14].mxu1  ;;  %v325_v9 = vadd.f32 %v577_v6, %v838_v36  ;;  %v319_v11 = vpop.f32.mrb[15].mxu0 }
 0x120   :  { %v453_v8 = vmax.f32 %v421_v2, %v437_v3  ;;  %v405_v10 = vadd.f32 %v601_v7, %v838_v36  ;;  %v399_v12 = vpop.f32.mrb[15].mxu1  ;;  %v320_v14 = vadd.f32 %v838_v36, %v319_v11 }
 0x121   :  { %v452_v13 = vmax.f32 %v420_v4, %v436_v5  ;;  %v400_v15 = vadd.f32 %v838_v36, %v399_v12  ;;  %v423_v16 = vmax.f32 %v325_v9, 0.0 }
 0x122   :  { %470 = vst.msk [vmem:[%s939_s3 + $0x68] sm:$0xff] %vm456_vm2, %v453_v8  ;;  %v439_v17 = vmax.f32 %v405_v10, 0.0  ;;  %v422_v18 = vmax.f32 %v320_v14, 0.0 }
 0x123   :  { %469 = vst.msk [vmem:[%s939_s3 + $0x60] sm:$0xff] %vm456_vm2, %v452_v13  ;;  %v438_v19 = vmax.f32 %v400_v15, 0.0 }
 0x124   :  { %v455_v20 = vmax.f32 %v423_v16, %v439_v17 }
 0x125   :  { %v454_v21 = vmax.f32 %v422_v18, %v438_v19 }
 0x126   :  { %472 = vst.msk [vmem:[%s939_s3 + $0x78] sm:$0xff] %vm456_vm2, %v455_v20 }
 0x127   :  { %471 = vst.msk [vmem:[%s939_s3 + $0x70] sm:$0xff] %vm456_vm2, %v454_v21 }
 0x128   :  { %477 = vsyncpa [#allocation3], 1 }
 0x129   :  { %478 = vsyncpa [#allocation5], 1 }

// kernel: cnn_rnn_forward.3
= control target key start
LH: loop header
LB: loop body
LE: loop exit
PB: predicated region body
PF: predicated region fallthrough
CT: control target
= control target key end

     0   :  { %v5672_v36 = vmov 1983009808   ;;  %v48_v38 = vlaneseq  ;;  %s5674_s24 = smov 64   ;;  %vm4032_vm0 = vcmask 523264   ;;  %vm5676_vm1 = vmmov 0   ;;  %s7516_s1 = inlined_call_operand.vmem [shape: bf16[4096,192], index: 1, kind: input, shape index: {}]   ;;  %s7517_s0 = inlined_call_operand.vmem [shape: f32[2,4096], index: 0, kind: input, shape index: {}]   ;;  %s7518_s3 = inlined_call_operand.vmem [shape: f32[64,192], index: 3, kind: input, shape index: {}]   ;;  %s7519_s2 = inlined_call_operand.vmem [shape: f32[1,192], index: 2, kind: input, shape index: {}]   ;;  %s7520_s4 = inlined_call_operand.vmem [shape: f32[1,192], index: 4, kind: input, shape index: {}]   ;;  %s7521_s5 = inlined_call_operand.vmem [shape: f32[64,1], index: 5, kind: input, shape index: {}]   ;;  %s7522_s6 = inlined_call_operand.<no memory space> [shape: f32[1,1], index: 6, kind: input, shape index: {}]   ;;  %s7523_s7 = inlined_call_operand.vmem [shape: f32[2,1], index: 7, kind: output, shape index: {}]  }
   0x1   :  { %v4868_v0 = vld [vmem:[%s7516_s1 + $0x4] ss:$8 sps:$4 sm:$0xff]   ;;  %v4872_v2 = vld [vmem:[%s7516_s1] ss:$8 sps:$4 sm:$0xff]   ;;  %v4874_v4 = vld [vmem:[%s7516_s1 + $0x14] ss:$8 sps:$4 sm:$0xff]   ;;  %v46_v37 = vunpack.c.l.s4 %v5672_v36 }
   0x2   :  { %v4870_v1 = vld [vmem:[%s7516_s1 + $0x804] ss:$8 sps:$4 sm:$0xff]   ;;  %3328 = vmatprep.subr.bf16.mxu1 %v4868_v0  ;;  %v4873_v3 = vld [vmem:[%s7516_s1 + $0x800] ss:$8 sps:$4 sm:$0xff]   ;;  %v4876_v5 = vld [vmem:[%s7516_s1 + $0x814] ss:$8 sps:$4 sm:$0xff]  }
   0x3   :  { %3656 = vmatprep.subr.bf16.mxu0 %v4870_v1  ;;  %3329 = vmatpush1.bf16.msra.mxu1 %v4872_v2  ;;  %v4878_v6 = vld [vmem:[%s7516_s1 + $0x10] ss:$8 sps:$4 sm:$0xff]   ;;  %v4880_v8 = vld [vmem:[%s7516_s1 + $0x24] ss:$8 sps:$4 sm:$0xff]   ;;  %v4884_v10 = vld [vmem:[%s7516_s1 + $0x20] ss:$8 sps:$4 sm:$0xff]   ;;  %v47_v42 = vunpack.c.0.s8 %v46_v37 }
   0x4   :  { %3657 = vmatpush1.bf16.msra.mxu0 %v4873_v3  ;;  %3330 = vmatprep.subr.bf16.mxu1 %v4874_v4  ;;  %v4879_v7 = vld [vmem:[%s7516_s1 + $0x810] ss:$8 sps:$4 sm:$0xff]   ;;  %v4882_v9 = vld [vmem:[%s7516_s1 + $0x824] ss:$8 sps:$4 sm:$0xff]   ;;  %v4885_v11 = vld [vmem:[%s7516_s1 + $0x820] ss:$8 sps:$4 sm:$0xff]  }
   0x5   :  { %3658 = vmatprep.subr.bf16.mxu0 %v4876_v5  ;;  %v4886_v12 = vld [vmem:[%s7516_s1 + $0x34] ss:$8 sps:$4 sm:$0xff]   ;;  %v4890_v14 = vld [vmem:[%s7516_s1 + $0x30] ss:$8 sps:$4 sm:$0xff]   ;;  %v4892_v16 = vld [vmem:[%s7516_s1 + $0x44] ss:$8 sps:$4 sm:$0xff]  }
   0x6   :  { %v4888_v13 = vld [vmem:[%s7516_s1 + $0x834] ss:$8 sps:$4 sm:$0xff]   ;;  %v4891_v15 = vld [vmem:[%s7516_s1 + $0x830] ss:$8 sps:$4 sm:$0xff]   ;;  %v4894_v17 = vld [vmem:[%s7516_s1 + $0x844] ss:$8 sps:$4 sm:$0xff]  }
   0x7   :  { %3331 = vmatpush1.bf16.msra.mxu1 %v4878_v6  ;;  %v4896_v18 = vld [vmem:[%s7516_s1 + $0x40] ss:$8 sps:$4 sm:$0xff]   ;;  %v4898_v20 = vld [vmem:[%s7516_s1 + $0x54] ss:$8 sps:$4 sm:$0xff]   ;;  %v4902_v22 = vld [vmem:[%s7516_s1 + $0x50] ss:$8 sps:$4 sm:$0xff]  }
   0x8   :  { %3659 = vmatpush1.bf16.msra.mxu0 %v4879_v7  ;;  %3332 = vmatprep.subr.bf16.mxu1 %v4880_v8  ;;  %v4897_v19 = vld [vmem:[%s7516_s1 + $0x840] ss:$8 sps:$4 sm:$0xff]   ;;  %v4900_v21 = vld [vmem:[%s7516_s1 + $0x854] ss:$8 sps:$4 sm:$0xff]   ;;  %v4903_v23 = vld [vmem:[%s7516_s1 + $0x850] ss:$8 sps:$4 sm:$0xff]  }
   0x9   :  { %3660 = vmatprep.subr.bf16.mxu0 %v4882_v9  ;;  %v4904_v24 = vld [vmem:[%s7516_s1 + $0x64] ss:$8 sps:$4 sm:$0xff]   ;;  %v4908_v26 = vld [vmem:[%s7516_s1 + $0x60] ss:$8 sps:$4 sm:$0xff]   ;;  %v4910_v28 = vld [vmem:[%s7516_s1 + $0x74] ss:$8 sps:$4 sm:$0xff]  }
   0xa   :  { %v4906_v25 = vld [vmem:[%s7516_s1 + $0x864] ss:$8 sps:$4 sm:$0xff]   ;;  %v4909_v27 = vld [vmem:[%s7516_s1 + $0x860] ss:$8 sps:$4 sm:$0xff]   ;;  %v4912_v29 = vld [vmem:[%s7516_s1 + $0x874] ss:$8 sps:$4 sm:$0xff]  }
   0xb   :  { %3333 = vmatpush1.bf16.msra.mxu1 %v4884_v10  ;;  %v4914_v30 = vld [vmem:[%s7516_s1 + $0x70] ss:$8 sps:$4 sm:$0xff]   ;;  %v4916_v32 = vld [vmem:[%s7516_s1 + $0x84] ss:$8 sps:$4 sm:$0xff]   ;;  %v4920_v34 = vld [vmem:[%s7516_s1 + $0x80] ss:$8 sps:$4 sm:$0xff]  }
   0xc   :  { %3661 = vmatpush1.bf16.msra.mxu0 %v4885_v11  ;;  %3334 = vmatprep.subr.bf16.mxu1 %v4886_v12  ;;  %v4915_v31 = vld [vmem:[%s7516_s1 + $0x870] ss:$8 sps:$4 sm:$0xff]   ;;  %v4918_v33 = vld [vmem:[%s7516_s1 + $0x884] ss:$8 sps:$4 sm:$0xff]   ;;  %v4921_v35 = vld [vmem:[%s7516_s1 + $0x880] ss:$8 sps:$4 sm:$0xff]  }
   0xd   :  { %3662 = vmatprep.subr.bf16.mxu0 %v4888_v13  ;;  %v4922_v39 = vld [vmem:[%s7516_s1 + $0x94] ss:$8 sps:$4 sm:$0xff]   ;;  %v4926_v41 = vld [vmem:[%s7516_s1 + $0x90] ss:$8 sps:$4 sm:$0xff]   ;;  %v5834_v43 = vshrl.u32 %v48_v38, 7  ;;  %v28_v52 = vld [vmem:[%s7517_s0] sm:$0xff] }
   0xe   :  { %v4924_v40 = vld [vmem:[%s7516_s1 + $0x894] ss:$8 sps:$4 sm:$0xff]   ;;  %v4927_v44 = vld [vmem:[%s7516_s1 + $0x890] ss:$8 sps:$4 sm:$0xff]   ;;  %v4928_v45 = vld [vmem:[%s7516_s1 + $0xa4] ss:$8 sps:$4 sm:$0xff]   ;;  %v44_v8 = vcombine.high %v28_v52, %v28_v52 }
   0xf   :  { %3335 = vmatpush1.bf16.msra.mxu1 %v4890_v14  ;;  %v4930_v46 = vld [vmem:[%s7516_s1 + $0x8a4] ss:$8 sps:$4 sm:$0xff]   ;;  %v4932_v47 = vld [vmem:[%s7516_s1 + $0xa0] ss:$8 sps:$4 sm:$0xff]   ;;  %v5852_v49 = vsub.s32 %v47_v42, %v5834_v43  ;;  %v4934_v50 = vld [vmem:[%s7516_s1 + $0xb4] ss:$8 sps:$4 sm:$0xff]  }
  0x10   :  { %3663 = vmatpush1.bf16.msra.mxu0 %v4891_v15  ;;  %3336 = vmatprep.subr.bf16.mxu1 %v4892_v16  ;;  %v4933_v48 = vld [vmem:[%s7516_s1 + $0x8a0] ss:$8 sps:$4 sm:$0xff]   ;;  %v4936_v51 = vld [vmem:[%s7516_s1 + $0x8b4] ss:$8 sps:$4 sm:$0xff]   ;;  %v4938_v53 = vld [vmem:[%s7516_s1 + $0xb0] ss:$8 sps:$4 sm:$0xff]  }
  0x11   :  { %3664 = vmatprep.subr.bf16.mxu0 %v4894_v17  ;;  %v5867_v54 = vrot.slane %v28_v52, %v5852_v49  ;;  %v4939_v55 = vld [vmem:[%s7516_s1 + $0x8b0] ss:$8 sps:$4 sm:$0xff]   ;;  %v32_v56 = vld [vmem:[%s7517_s0 + $0x20] sm:$0xff]  ;;  %v4946_v1 = vld [vmem:[%s7516_s1 + $0xd4] ss:$8 sps:$4 sm:$0xff]   ;;  %v5921_v14 = vrot.slane %v44_v8, %v5852_v49  ;;  %vm4221_vm2 = vcmask 1024  }
  0x12   :  { %v4940_v57 = vld [vmem:[%s7516_s1 + $0xc4] ss:$8 sps:$4 sm:$0xff]   ;;  %v119_v60 = vrot.slane %v32_v56, %v5852_v49  ;;  %v4944_v63 = vld [vmem:[%s7516_s1 + $0xc0] ss:$8 sps:$4 sm:$0xff]   ;;  %v4948_v2 = vld [vmem:[%s7516_s1 + $0x8d4] ss:$8 sps:$4 sm:$0xff]   ;;  %v112_v9 = vcombine.high %v32_v56, %v32_v56 }
  0x13   :  { %3337 = vmatpush1.bf16.msra.mxu1 %v4896_v18  ;;  %v4942_v58 = vld [vmem:[%s7516_s1 + $0x8c4] ss:$8 sps:$4 sm:$0xff]   ;;  %v59_v59 = vcombine.high %v5867_v54, %v5867_v54  ;;  %v4945_v0 = vld [vmem:[%s7516_s1 + $0x8c0] ss:$8 sps:$4 sm:$0xff]   ;;  %v4950_v4 = vld [vmem:[%s7516_s1 + $0xd0] ss:$8 sps:$4 sm:$0xff]  }
  0x14   :  { %3665 = vmatpush1.bf16.msra.mxu0 %v4897_v19  ;;  %3338 = vmatprep.subr.bf16.mxu1 %v4898_v20  ;;  %v127_v62 = vcombine.high %v119_v60, %v119_v60  ;;  %v4951_v5 = vld [vmem:[%s7516_s1 + $0x8d0] ss:$8 sps:$4 sm:$0xff]   ;;  %v4952_v6 = vld [vmem:[%s7516_s1 + $0xe4] ss:$8 sps:$4 sm:$0xff]   ;;  %v4956_v10 = vld [vmem:[%s7516_s1 + $0xe0] ss:$8 sps:$4 sm:$0xff]   ;;  %v5924_v15 = vrot.slane %v112_v9, %v5852_v49  ;;  %v60_v20 = vcombine.high %v5921_v14, %v5921_v14 }
  0x15   :  { %3666 = vmatprep.subr.bf16.mxu0 %v4900_v21  ;;  %v213_v61 = vpack.c.bf16 %v59_v59, %v59_v59  ;;  %v4954_v7 = vld [vmem:[%s7516_s1 + $0x8e4] ss:$8 sps:$4 sm:$0xff]   ;;  %v4957_v11 = vld [vmem:[%s7516_s1 + $0x8e0] ss:$8 sps:$4 sm:$0xff]   ;;  %v4958_v12 = vld [vmem:[%s7516_s1 + $0xf4] ss:$8 sps:$4 sm:$0xff]  }
  0x16   :  { %v229_v3 = vpack.c.bf16 %v127_v62, %v127_v62  ;;  %v4960_v13 = vld [vmem:[%s7516_s1 + $0x8f4] ss:$8 sps:$4 sm:$0xff]   ;;  %v4962_v16 = vld [vmem:[%s7516_s1 + $0xf0] ss:$8 sps:$4 sm:$0xff]   ;;  %v4967_v18 = vld [vmem:[%s7516_s1 + $0x104] ss:$8 sps:$4 sm:$0xff]   ;;  %v128_v21 = vcombine.high %v5924_v15, %v5924_v15 }
  0x17   :  { %3339 = vmatpush1.bf16.msra.mxu1 %v4902_v22  ;;  %3360 = vmatprep.mubr.bf16.mxu1 %v213_v61  ;;  %v4963_v17 = vld [vmem:[%s7516_s1 + $0x8f0] ss:$8 sps:$4 sm:$0xff]   ;;  %v4971_v19 = vld [vmem:[%s7516_s1 + $0x904] ss:$8 sps:$4 sm:$0xff]   ;;  %v212_v22 = vpack.c.bf16 %v5867_v54, %v5867_v54  ;;  %v4986_v36 = vld [vmem:[%s7516_s1 + $0x134] ss:$8 sps:$4 sm:$0xff]  }
  0x18   :  { %3667 = vmatpush1.bf16.msra.mxu0 %v4903_v23  ;;  %3340 = vmatprep.subr.bf16.mxu1 %v4904_v24  ;;  %v228_v23 = vpack.c.bf16 %v119_v60, %v119_v60  ;;  %v4965_v24 = vld [vmem:[%s7516_s1 + $0x100] ss:$8 sps:$4 sm:$0xff]   ;;  %v4989_v37 = vld [vmem:[%s7516_s1 + $0x934] ss:$8 sps:$4 sm:$0xff]   ;;  %v4984_v38 = vld [vmem:[%s7516_s1 + $0x130] ss:$8 sps:$4 sm:$0xff]  }
  0x19   :  { %3668 = vmatprep.subr.bf16.mxu0 %v4906_v25  ;;  %3688 = vmatprep.mubr.bf16.mxu0 %v229_v3  ;;  %v4969_v25 = vld [vmem:[%s7516_s1 + $0x900] ss:$8 sps:$4 sm:$0xff]   ;;  %v5010_v54 = vld [vmem:[%s7516_s1 + $0x174] ss:$8 sps:$4 sm:$0xff]   ;;  %v5008_v56 = vld [vmem:[%s7516_s1 + $0x170] ss:$8 sps:$4 sm:$0xff]  }
  0x1a   :  { %v4990_v42 = vld [vmem:[%s7516_s1 + $0x140] ss:$8 sps:$4 sm:$0xff]   ;;  %v5019_v59 = vld [vmem:[%s7516_s1 + $0x984] ss:$8 sps:$4 sm:$0xff]   ;;  %v5022_v62 = vld [vmem:[%s7516_s1 + $0x194] ss:$8 sps:$4 sm:$0xff]  }
  0x1b   :  { %3341 = vmatpush1.bf16.msra.mxu1 %v4908_v26  ;;  %v4974_v26 = vld [vmem:[%s7516_s1 + $0x114] ss:$8 sps:$4 sm:$0xff]   ;;  %v5002_v52 = vld [vmem:[%s7516_s1 + $0x160] ss:$8 sps:$4 sm:$0xff]   ;;  %v5031_v3 = vld [vmem:[%s7516_s1 + $0x9a4] ss:$8 sps:$4 sm:$0xff]  }
  0x1c   :  { %3669 = vmatpush1.bf16.msra.mxu0 %v4909_v27  ;;  %3342 = vmatprep.subr.bf16.mxu1 %v4910_v28  ;;  %v4977_v27 = vld [vmem:[%s7516_s1 + $0x914] ss:$8 sps:$4 sm:$0xff]   ;;  %v215_v28 = vpack.c.bf16 %v60_v20, %v60_v20  ;;  %v5014_v60 = vld [vmem:[%s7516_s1 + $0x180] ss:$8 sps:$4 sm:$0xff]   ;;  %v5032_v8 = vld [vmem:[%s7516_s1 + $0x1b0] ss:$8 sps:$4 sm:$0xff]  }
  0x1d   :  { %3670 = vmatprep.subr.bf16.mxu0 %v4912_v29  ;;  %v231_v29 = vpack.c.bf16 %v128_v21, %v128_v21  ;;  %v5017_v61 = vld [vmem:[%s7516_s1 + $0x980] ss:$8 sps:$4 sm:$0xff]   ;;  %v5035_v9 = vld [vmem:[%s7516_s1 + $0x9b0] ss:$8 sps:$4 sm:$0xff]   ;;  %v5052_v20 = vld [vmem:[%s7516_s1 + $0x1e4] ss:$8 sps:$4 sm:$0xff]  }
  0x1e   :  { %v5055_v21 = vld [vmem:[%s7516_s1 + $0x9e4] ss:$8 sps:$4 sm:$0xff]  }
  0x1f   :  { %3343 = vmatpush1.bf16.msra.mxu1 %v4914_v30  ;;  %v4972_v30 = vld [vmem:[%s7516_s1 + $0x110] ss:$8 sps:$4 sm:$0xff]  }
  0x20   :  { %3671 = vmatpush1.bf16.msra.mxu0 %v4915_v31  ;;  %3344 = vmatprep.subr.bf16.mxu1 %v4916_v32  ;;  %v4975_v31 = vld [vmem:[%s7516_s1 + $0x910] ss:$8 sps:$4 sm:$0xff]   ;;  %v4980_v32 = vld [vmem:[%s7516_s1 + $0x124] ss:$8 sps:$4 sm:$0xff]  }
  0x21   :  { %3672 = vmatprep.subr.bf16.mxu0 %v4918_v33  ;;  %v4983_v33 = vld [vmem:[%s7516_s1 + $0x924] ss:$8 sps:$4 sm:$0xff]  }
  0x23   :  { %3345 = vmatpush1.bf16.msra.mxu1 %v4920_v34  ;;  %v4978_v34 = vld [vmem:[%s7516_s1 + $0x120] ss:$8 sps:$4 sm:$0xff]  }
  0x24   :  { %3673 = vmatpush1.bf16.msra.mxu0 %v4921_v35  ;;  %3346 = vmatprep.subr.bf16.mxu1 %v4922_v39  ;;  %v4981_v35 = vld [vmem:[%s7516_s1 + $0x920] ss:$8 sps:$4 sm:$0xff]   ;;  %v4987_v39 = vld [vmem:[%s7516_s1 + $0x930] ss:$8 sps:$4 sm:$0xff]  }
  0x25   :  { %3674 = vmatprep.subr.bf16.mxu0 %v4924_v40  ;;  %v4992_v40 = vld [vmem:[%s7516_s1 + $0x144] ss:$8 sps:$4 sm:$0xff]  }
  0x27   :  { %3347 = vmatpush1.bf16.msra.mxu1 %v4926_v41  ;;  %v4995_v41 = vld [vmem:[%s7516_s1 + $0x944] ss:$8 sps:$4 sm:$0xff]  }
  0x28   :  { %3675 = vmatpush1.bf16.msra.mxu0 %v4927_v44  ;;  %3348 = vmatprep.subr.bf16.mxu1 %v4928_v45  ;;  %v4993_v44 = vld [vmem:[%s7516_s1 + $0x940] ss:$8 sps:$4 sm:$0xff]   ;;  %v4998_v45 = vld [vmem:[%s7516_s1 + $0x154] ss:$8 sps:$4 sm:$0xff]  }
  0x29   :  { %3676 = vmatprep.subr.bf16.mxu0 %v4930_v46  ;;  %v5001_v46 = vld [vmem:[%s7516_s1 + $0x954] ss:$8 sps:$4 sm:$0xff]  }
  0x2b   :  { %3349 = vmatpush1.bf16.msra.mxu1 %v4932_v47  ;;  %v4996_v47 = vld [vmem:[%s7516_s1 + $0x150] ss:$8 sps:$4 sm:$0xff]  }
  0x2c   :  { %3677 = vmatpush1.bf16.msra.mxu0 %v4933_v48  ;;  %3350 = vmatprep.subr.bf16.mxu1 %v4934_v50  ;;  %v4999_v48 = vld [vmem:[%s7516_s1 + $0x950] ss:$8 sps:$4 sm:$0xff]   ;;  %v5004_v50 = vld [vmem:[%s7516_s1 + $0x164] ss:$8 sps:$4 sm:$0xff]  }
  0x2d   :  { %3678 = vmatprep.subr.bf16.mxu0 %v4936_v51  ;;  %v5007_v51 = vld [vmem:[%s7516_s1 + $0x964] ss:$8 sps:$4 sm:$0xff]  }
  0x2f   :  { %3351 = vmatpush1.bf16.msra.mxu1 %v4938_v53  ;;  %v5005_v53 = vld [vmem:[%s7516_s1 + $0x960] ss:$8 sps:$4 sm:$0xff]  }
  0x30   :  { %3679 = vmatpush1.bf16.msra.mxu0 %v4939_v55  ;;  %3352 = vmatprep.subr.bf16.mxu1 %v4940_v57  ;;  %v5013_v55 = vld [vmem:[%s7516_s1 + $0x974] ss:$8 sps:$4 sm:$0xff]   ;;  %v5011_v57 = vld [vmem:[%s7516_s1 + $0x970] ss:$8 sps:$4 sm:$0xff]  }
  0x31   :  { %3680 = vmatprep.subr.bf16.mxu0 %v4942_v58  ;;  %v5016_v58 = vld [vmem:[%s7516_s1 + $0x184] ss:$8 sps:$4 sm:$0xff]  }
  0x33   :  { %3353 = vmatpush1.bf16.msra.mxu1 %v4944_v63  ;;  %v5025_v63 = vld [vmem:[%s7516_s1 + $0x994] ss:$8 sps:$4 sm:$0xff]  }
  0x34   :  { %3681 = vmatpush1.bf16.msra.mxu0 %v4945_v0  ;;  %3354 = vmatprep.subr.bf16.mxu1 %v4946_v1  ;;  %v5020_v0 = vld [vmem:[%s7516_s1 + $0x190] ss:$8 sps:$4 sm:$0xff]  }
  0x35   :  { %3682 = vmatprep.subr.bf16.mxu0 %v4948_v2  ;;  %v5023_v1 = vld [vmem:[%s7516_s1 + $0x990] ss:$8 sps:$4 sm:$0xff]   ;;  %v5028_v2 = vld [vmem:[%s7516_s1 + $0x1a4] ss:$8 sps:$4 sm:$0xff]  }
  0x37   :  { %3355 = vmatpush1.bf16.msra.mxu1 %v4950_v4  ;;  %v5026_v4 = vld [vmem:[%s7516_s1 + $0x1a0] ss:$8 sps:$4 sm:$0xff]  }
  0x38   :  { %3683 = vmatpush1.bf16.msra.mxu0 %v4951_v5  ;;  %3356 = vmatprep.subr.bf16.mxu1 %v4952_v6  ;;  %v5029_v5 = vld [vmem:[%s7516_s1 + $0x9a0] ss:$8 sps:$4 sm:$0xff]   ;;  %v5034_v6 = vld [vmem:[%s7516_s1 + $0x1b4] ss:$8 sps:$4 sm:$0xff]  }
  0x39   :  { %3684 = vmatprep.subr.bf16.mxu0 %v4954_v7  ;;  %v5037_v7 = vld [vmem:[%s7516_s1 + $0x9b4] ss:$8 sps:$4 sm:$0xff]  }
  0x3b   :  { %3357 = vmatpush1.bf16.msra.mxu1 %v4956_v10  ;;  %v5040_v10 = vld [vmem:[%s7516_s1 + $0x1c4] ss:$8 sps:$4 sm:$0xff]  }
  0x3c   :  { %3685 = vmatpush1.bf16.msra.mxu0 %v4957_v11  ;;  %3358 = vmatprep.subr.bf16.mxu1 %v4958_v12  ;;  %v5043_v11 = vld [vmem:[%s7516_s1 + $0x9c4] ss:$8 sps:$4 sm:$0xff]   ;;  %v5038_v12 = vld [vmem:[%s7516_s1 + $0x1c0] ss:$8 sps:$4 sm:$0xff]  }
  0x3d   :  { %3686 = vmatprep.subr.bf16.mxu0 %v4960_v13  ;;  %v5041_v13 = vld [vmem:[%s7516_s1 + $0x9c0] ss:$8 sps:$4 sm:$0xff]  }
  0x3f   :  { %3359 = vmatpush1.bf16.msra.mxu1 %v4962_v16  ;;  %v5046_v16 = vld [vmem:[%s7516_s1 + $0x1d4] ss:$8 sps:$4 sm:$0xff]  }
  0x40   :  { %3687 = vmatpush1.bf16.msra.mxu0 %v4963_v17  ;;  %3369 = vmatprep.subr.bf16.mxu1 %v4967_v18  ;;  %v5049_v17 = vld [vmem:[%s7516_s1 + $0x9d4] ss:$8 sps:$4 sm:$0xff]   ;;  %v5044_v18 = vld [vmem:[%s7516_s1 + $0x1d0] ss:$8 sps:$4 sm:$0xff]  }
  0x41   :  { %3697 = vmatprep.subr.bf16.mxu0 %v4971_v19  ;;  %v5047_v19 = vld [vmem:[%s7516_s1 + $0x9d0] ss:$8 sps:$4 sm:$0xff]  }
  0x42   :  { %3361 = vmatmul.mubr.bf16.vlgmr.msra.gmra.mrb[0].mxu1 %v212_v22  ;;  %v5050_v22 = vld [vmem:[%s7516_s1 + $0x1e0] ss:$8 sps:$4 sm:$0xff]  }
  0x43   :  { %3689 = vmatmul.mubr.bf16.vlgmr.msra.gmra.mrb[0].mxu0 %v228_v23  ;;  %3370 = vmatpush1.bf16.msra.mxu1 %v4965_v24  ;;  %v5053_v23 = vld [vmem:[%s7516_s1 + $0x9e0] ss:$8 sps:$4 sm:$0xff]   ;;  %v5058_v24 = vld [vmem:[%s7516_s1 + $0x1f4] ss:$8 sps:$4 sm:$0xff]  }
  0x44   :  { %3698 = vmatpush1.bf16.msra.mxu0 %v4969_v25  ;;  %3371 = vmatprep.subr.bf16.mxu1 %v4974_v26  ;;  %v5061_v25 = vld [vmem:[%s7516_s1 + $0x9f4] ss:$8 sps:$4 sm:$0xff]   ;;  %v5056_v26 = vld [vmem:[%s7516_s1 + $0x1f0] ss:$8 sps:$4 sm:$0xff]  }
  0x45   :  { %3699 = vmatprep.subr.bf16.mxu0 %v4977_v27  ;;  %3401 = vmatprep.mubr.bf16.mxu1 %v215_v28  ;;  %v5059_v27 = vld [vmem:[%s7516_s1 + $0x9f0] ss:$8 sps:$4 sm:$0xff]   ;;  %v5064_v28 = vld [vmem:[%s7516_s1 + $0x204] ss:$8 sps:$4 sm:$0xff]  }
  0x46   :  { %3729 = vmatprep.mubr.bf16.mxu0 %v231_v29  ;;  %v5067_v29 = vld [vmem:[%s7516_s1 + $0xa04] ss:$8 sps:$4 sm:$0xff]  }
  0x47   :  { %3372 = vmatpush1.bf16.msra.mxu1 %v4972_v30  ;;  %v5062_v30 = vld [vmem:[%s7516_s1 + $0x200] ss:$8 sps:$4 sm:$0xff]  }
  0x48   :  { %3700 = vmatpush1.bf16.msra.mxu0 %v4975_v31  ;;  %3373 = vmatprep.subr.bf16.mxu1 %v4980_v32  ;;  %v214_v31 = vpack.c.bf16 %v5921_v14, %v5921_v14  ;;  %v230_v32 = vpack.c.bf16 %v5924_v15, %v5924_v15  ;;  %v5073_v14 = vld [vmem:[%s7516_s1 + $0xa14] ss:$8 sps:$4 sm:$0xff]  }
  0x49   :  { %3701 = vmatprep.subr.bf16.mxu0 %v4983_v33  ;;  %v5065_v33 = vld [vmem:[%s7516_s1 + $0xa00] ss:$8 sps:$4 sm:$0xff]  }
  0x4b   :  { %3374 = vmatpush1.bf16.msra.mxu1 %v4978_v34  ;;  %v5070_v34 = vld [vmem:[%s7516_s1 + $0x214] ss:$8 sps:$4 sm:$0xff]  }
  0x4c   :  { %3702 = vmatpush1.bf16.msra.mxu0 %v4981_v35  ;;  %3375 = vmatprep.subr.bf16.mxu1 %v4986_v36  ;;  %v6152_v35 = vld [vmem:[%s7517_s0 + $0x8] sm:$0xff] }
  0x4d   :  { %3703 = vmatprep.subr.bf16.mxu0 %v4989_v37  ;;  %v6159_v15 = vrot.slane %v6152_v35, %v5852_v49  ;;  %v6164_v36 = vld [vmem:[%s7517_s0 + $0x28] sm:$0xff]  ;;  %v5068_v37 = vld [vmem:[%s7516_s1 + $0x210] ss:$8 sps:$4 sm:$0xff]  }
  0x4f   :  { %3376 = vmatpush1.bf16.msra.mxu1 %v4984_v38  ;;  %v5071_v38 = vld [vmem:[%s7516_s1 + $0xa10] ss:$8 sps:$4 sm:$0xff]  }
  0x50   :  { %3704 = vmatpush1.bf16.msra.mxu0 %v4987_v39  ;;  %3377 = vmatprep.subr.bf16.mxu1 %v4992_v40  ;;  %v76_v39 = vcombine.high %v6159_v15, %v6159_v15  ;;  %v6176_v40 = vrot.slane %v6164_v36, %v5852_v49 }
  0x51   :  { %3705 = vmatprep.subr.bf16.mxu0 %v4995_v41  ;;  %v5076_v41 = vld [vmem:[%s7516_s1 + $0x224] ss:$8 sps:$4 sm:$0xff]  }
  0x53   :  { %3378 = vmatpush1.bf16.msra.mxu1 %v4990_v42  ;;  %v5079_v42 = vld [vmem:[%s7516_s1 + $0xa24] ss:$8 sps:$4 sm:$0xff]  }
  0x54   :  { %3706 = vmatpush1.bf16.msra.mxu0 %v4993_v44  ;;  %3379 = vmatprep.subr.bf16.mxu1 %v4998_v45  ;;  %v217_v44 = vpack.c.bf16 %v76_v39, %v76_v39  ;;  %v144_v45 = vcombine.high %v6176_v40, %v6176_v40  ;;  %v5154_v39 = vld [vmem:[%s7516_s1 + $0x2f4] ss:$8 sps:$4 sm:$0xff]  }
  0x55   :  { %3707 = vmatprep.subr.bf16.mxu0 %v5001_v46  ;;  %v5074_v46 = vld [vmem:[%s7516_s1 + $0x220] ss:$8 sps:$4 sm:$0xff]  }
  0x57   :  { %3380 = vmatpush1.bf16.msra.mxu1 %v4996_v47  ;;  %v5077_v47 = vld [vmem:[%s7516_s1 + $0xa20] ss:$8 sps:$4 sm:$0xff]  }
  0x58   :  { %3708 = vmatpush1.bf16.msra.mxu0 %v4999_v48  ;;  %3381 = vmatprep.subr.bf16.mxu1 %v5004_v50  ;;  %v233_v48 = vpack.c.bf16 %v144_v45, %v144_v45  ;;  %v5082_v50 = vld [vmem:[%s7516_s1 + $0x234] ss:$8 sps:$4 sm:$0xff]   ;;  %v5160_v45 = vld [vmem:[%s7516_s1 + $0x304] ss:$8 sps:$4 sm:$0xff]  }
  0x59   :  { %3709 = vmatprep.subr.bf16.mxu0 %v5007_v51  ;;  %v5085_v51 = vld [vmem:[%s7516_s1 + $0xa34] ss:$8 sps:$4 sm:$0xff]  }
  0x5b   :  { %3382 = vmatpush1.bf16.msra.mxu1 %v5002_v52  ;;  %v5080_v52 = vld [vmem:[%s7516_s1 + $0x230] ss:$8 sps:$4 sm:$0xff]  }
  0x5c   :  { %3710 = vmatpush1.bf16.msra.mxu0 %v5005_v53  ;;  %3383 = vmatprep.subr.bf16.mxu1 %v5010_v54  ;;  %v5083_v53 = vld [vmem:[%s7516_s1 + $0xa30] ss:$8 sps:$4 sm:$0xff]   ;;  %v5088_v54 = vld [vmem:[%s7516_s1 + $0x244] ss:$8 sps:$4 sm:$0xff]  }
  0x5d   :  { %3711 = vmatprep.subr.bf16.mxu0 %v5013_v55  ;;  %v5091_v55 = vld [vmem:[%s7516_s1 + $0xa44] ss:$8 sps:$4 sm:$0xff]  }
  0x5f   :  { %3384 = vmatpush1.bf16.msra.mxu1 %v5008_v56  ;;  %v5086_v56 = vld [vmem:[%s7516_s1 + $0x240] ss:$8 sps:$4 sm:$0xff]  }
  0x60   :  { %3712 = vmatpush1.bf16.msra.mxu0 %v5011_v57  ;;  %3385 = vmatprep.subr.bf16.mxu1 %v5016_v58  ;;  %v5089_v57 = vld [vmem:[%s7516_s1 + $0xa40] ss:$8 sps:$4 sm:$0xff]   ;;  %v5094_v58 = vld [vmem:[%s7516_s1 + $0x254] ss:$8 sps:$4 sm:$0xff]  }
  0x61   :  { %3713 = vmatprep.subr.bf16.mxu0 %v5019_v59  ;;  %v5097_v59 = vld [vmem:[%s7516_s1 + $0xa54] ss:$8 sps:$4 sm:$0xff]  }
  0x63   :  { %3386 = vmatpush1.bf16.msra.mxu1 %v5014_v60  ;;  %v5092_v60 = vld [vmem:[%s7516_s1 + $0x250] ss:$8 sps:$4 sm:$0xff]  }
  0x64   :  { %3714 = vmatpush1.bf16.msra.mxu0 %v5017_v61  ;;  %3387 = vmatprep.subr.bf16.mxu1 %v5022_v62  ;;  %v5095_v61 = vld [vmem:[%s7516_s1 + $0xa50] ss:$8 sps:$4 sm:$0xff]   ;;  %v5100_v62 = vld [vmem:[%s7516_s1 + $0x264] ss:$8 sps:$4 sm:$0xff]  }
  0x65   :  { %3715 = vmatprep.subr.bf16.mxu0 %v5025_v63  ;;  %v5103_v63 = vld [vmem:[%s7516_s1 + $0xa64] ss:$8 sps:$4 sm:$0xff]  }
  0x67   :  { %3388 = vmatpush1.bf16.msra.mxu1 %v5020_v0  ;;  %v5098_v0 = vld [vmem:[%s7516_s1 + $0x260] ss:$8 sps:$4 sm:$0xff]  }
  0x68   :  { %3716 = vmatpush1.bf16.msra.mxu0 %v5023_v1  ;;  %3389 = vmatprep.subr.bf16.mxu1 %v5028_v2  ;;  %v5101_v1 = vld [vmem:[%s7516_s1 + $0xa60] ss:$8 sps:$4 sm:$0xff]   ;;  %v5106_v2 = vld [vmem:[%s7516_s1 + $0x274] ss:$8 sps:$4 sm:$0xff]  }
  0x69   :  { %3717 = vmatprep.subr.bf16.mxu0 %v5031_v3  ;;  %v5109_v3 = vld [vmem:[%s7516_s1 + $0xa74] ss:$8 sps:$4 sm:$0xff]  }
  0x6b   :  { %3390 = vmatpush1.bf16.msra.mxu1 %v5026_v4  ;;  %v5104_v4 = vld [vmem:[%s7516_s1 + $0x270] ss:$8 sps:$4 sm:$0xff]  }
  0x6c   :  { %3718 = vmatpush1.bf16.msra.mxu0 %v5029_v5  ;;  %3391 = vmatprep.subr.bf16.mxu1 %v5034_v6  ;;  %v5107_v5 = vld [vmem:[%s7516_s1 + $0xa70] ss:$8 sps:$4 sm:$0xff]   ;;  %v5112_v6 = vld [vmem:[%s7516_s1 + $0x284] ss:$8 sps:$4 sm:$0xff]  }
  0x6d   :  { %3719 = vmatprep.subr.bf16.mxu0 %v5037_v7  ;;  %v5115_v7 = vld [vmem:[%s7516_s1 + $0xa84] ss:$8 sps:$4 sm:$0xff]  }
  0x6f   :  { %3392 = vmatpush1.bf16.msra.mxu1 %v5032_v8  ;;  %v5110_v8 = vld [vmem:[%s7516_s1 + $0x280] ss:$8 sps:$4 sm:$0xff]  }
  0x70   :  { %3720 = vmatpush1.bf16.msra.mxu0 %v5035_v9  ;;  %3393 = vmatprep.subr.bf16.mxu1 %v5040_v10  ;;  %v5113_v9 = vld [vmem:[%s7516_s1 + $0xa80] ss:$8 sps:$4 sm:$0xff]   ;;  %v5118_v10 = vld [vmem:[%s7516_s1 + $0x294] ss:$8 sps:$4 sm:$0xff]  }
  0x71   :  { %3721 = vmatprep.subr.bf16.mxu0 %v5043_v11  ;;  %v5121_v11 = vld [vmem:[%s7516_s1 + $0xa94] ss:$8 sps:$4 sm:$0xff]  }
  0x73   :  { %3394 = vmatpush1.bf16.msra.mxu1 %v5038_v12  ;;  %v5116_v12 = vld [vmem:[%s7516_s1 + $0x290] ss:$8 sps:$4 sm:$0xff]  }
  0x74   :  { %3722 = vmatpush1.bf16.msra.mxu0 %v5041_v13  ;;  %3395 = vmatprep.subr.bf16.mxu1 %v5046_v16  ;;  %v5119_v13 = vld [vmem:[%s7516_s1 + $0xa90] ss:$8 sps:$4 sm:$0xff]   ;;  %v5124_v16 = vld [vmem:[%s7516_s1 + $0x2a4] ss:$8 sps:$4 sm:$0xff]  }
  0x75   :  { %3723 = vmatprep.subr.bf16.mxu0 %v5049_v17  ;;  %v5127_v17 = vld [vmem:[%s7516_s1 + $0xaa4] ss:$8 sps:$4 sm:$0xff]  }
  0x77   :  { %3396 = vmatpush1.bf16.msra.mxu1 %v5044_v18  ;;  %v5122_v18 = vld [vmem:[%s7516_s1 + $0x2a0] ss:$8 sps:$4 sm:$0xff]  }
  0x78   :  { %3724 = vmatpush1.bf16.msra.mxu0 %v5047_v19  ;;  %3397 = vmatprep.subr.bf16.mxu1 %v5052_v20  ;;  %v5125_v19 = vld [vmem:[%s7516_s1 + $0xaa0] ss:$8 sps:$4 sm:$0xff]   ;;  %v5130_v20 = vld [vmem:[%s7516_s1 + $0x2b4] ss:$8 sps:$4 sm:$0xff]  }
  0x79   :  { %3725 = vmatprep.subr.bf16.mxu0 %v5055_v21  ;;  %v5133_v21 = vld [vmem:[%s7516_s1 + $0xab4] ss:$8 sps:$4 sm:$0xff]  }
  0x7b   :  { %3398 = vmatpush1.bf16.msra.mxu1 %v5050_v22  ;;  %v5128_v22 = vld [vmem:[%s7516_s1 + $0x2b0] ss:$8 sps:$4 sm:$0xff]  }
  0x7c   :  { %3726 = vmatpush1.bf16.msra.mxu0 %v5053_v23  ;;  %3399 = vmatprep.subr.bf16.mxu1 %v5058_v24  ;;  %v5131_v23 = vld [vmem:[%s7516_s1 + $0xab0] ss:$8 sps:$4 sm:$0xff]   ;;  %v5136_v24 = vld [vmem:[%s7516_s1 + $0x2c4] ss:$8 sps:$4 sm:$0xff]  }
  0x7d   :  { %3727 = vmatprep.subr.bf16.mxu0 %v5061_v25  ;;  %v5139_v25 = vld [vmem:[%s7516_s1 + $0xac4] ss:$8 sps:$4 sm:$0xff]  }
  0x7f   :  { %3400 = vmatpush1.bf16.msra.mxu1 %v5056_v26  ;;  %v5134_v26 = vld [vmem:[%s7516_s1 + $0x2c0] ss:$8 sps:$4 sm:$0xff]  }
  0x80   :  { %3728 = vmatpush1.bf16.msra.mxu0 %v5059_v27  ;;  %3410 = vmatprep.subr.bf16.mxu1 %v5064_v28  ;;  %v5137_v27 = vld [vmem:[%s7516_s1 + $0xac0] ss:$8 sps:$4 sm:$0xff]   ;;  %v5142_v28 = vld [vmem:[%s7516_s1 + $0x2d4] ss:$8 sps:$4 sm:$0xff]  }
  0x81   :  { %3738 = vmatprep.subr.bf16.mxu0 %v5067_v29  ;;  %v5145_v29 = vld [vmem:[%s7516_s1 + $0xad4] ss:$8 sps:$4 sm:$0xff]  }
  0x82   :  { %3402 = vmatmul.mubr.bf16.vlgmr.msra.gmra.mrb[0].mxu1 %v214_v31  ;;  %v5143_v31 = vld [vmem:[%s7516_s1 + $0xad0] ss:$8 sps:$4 sm:$0xff]  }
  0x83   :  { %3730 = vmatmul.mubr.bf16.vlgmr.msra.gmra.mrb[0].mxu0 %v230_v32  ;;  %3411 = vmatpush1.bf16.msra.mxu1 %v5062_v30  ;;  %v5140_v30 = vld [vmem:[%s7516_s1 + $0x2d0] ss:$8 sps:$4 sm:$0xff]   ;;  %v5148_v32 = vld [vmem:[%s7516_s1 + $0x2e4] ss:$8 sps:$4 sm:$0xff]  }
  0x84   :  { %3739 = vmatpush1.bf16.msra.mxu0 %v5065_v33  ;;  %3412 = vmatprep.subr.bf16.mxu1 %v5070_v34  ;;  %v5151_v33 = vld [vmem:[%s7516_s1 + $0xae4] ss:$8 sps:$4 sm:$0xff]   ;;  %v61_v34 = vcombine.high %v6152_v35, %v6152_v35  ;;  %v5157_v35 = vld [vmem:[%s7516_s1 + $0xaf4] ss:$8 sps:$4 sm:$0xff]  }
  0x85   :  { %3740 = vmatprep.subr.bf16.mxu0 %v5073_v14  ;;  %3442 = vmatprep.mubr.bf16.mxu1 %v217_v44  ;;  %v129_v14 = vcombine.high %v6164_v36, %v6164_v36  ;;  %v5155_v44 = vld [vmem:[%s7516_s1 + $0xaf0] ss:$8 sps:$4 sm:$0xff]  }
  0x86   :  { %3770 = vmatprep.mubr.bf16.mxu0 %v233_v48  ;;  %v6347_v36 = vrot.slane %v61_v34, %v5852_v49  ;;  %v5224_v34 = vld [vmem:[%s7516_s1 + $0x3b0] ss:$8 sps:$4 sm:$0xff]  }
  0x87   :  { %3413 = vmatpush1.bf16.msra.mxu1 %v5068_v37  ;;  %v5146_v37 = vld [vmem:[%s7516_s1 + $0x2e0] ss:$8 sps:$4 sm:$0xff]  }
  0x88   :  { %3741 = vmatpush1.bf16.msra.mxu0 %v5071_v38  ;;  %3414 = vmatprep.subr.bf16.mxu1 %v5076_v41  ;;  %v5149_v38 = vld [vmem:[%s7516_s1 + $0xae0] ss:$8 sps:$4 sm:$0xff]   ;;  %v6350_v41 = vrot.slane %v129_v14, %v5852_v49  ;;  %v5227_v14 = vld [vmem:[%s7516_s1 + $0xbb0] ss:$8 sps:$4 sm:$0xff]  }
  0x89   :  { %3742 = vmatprep.subr.bf16.mxu0 %v5079_v42  ;;  %v5152_v42 = vld [vmem:[%s7516_s1 + $0x2f0] ss:$8 sps:$4 sm:$0xff]  }
  0x8a   :  { %v145_v48 = vcombine.high %v6350_v41, %v6350_v41 }
  0x8b   :  { %3415 = vmatpush1.bf16.msra.mxu1 %v5074_v46  ;;  %v5163_v46 = vld [vmem:[%s7516_s1 + $0xb04] ss:$8 sps:$4 sm:$0xff]  }
  0x8c   :  { %3743 = vmatpush1.bf16.msra.mxu0 %v5077_v47  ;;  %3416 = vmatprep.subr.bf16.mxu1 %v5082_v50  ;;  %v77_v47 = vcombine.high %v6347_v36, %v6347_v36  ;;  %v5158_v50 = vld [vmem:[%s7516_s1 + $0x300] ss:$8 sps:$4 sm:$0xff]  }
  0x8d   :  { %3744 = vmatprep.subr.bf16.mxu0 %v5085_v51  ;;  %v5161_v51 = vld [vmem:[%s7516_s1 + $0xb00] ss:$8 sps:$4 sm:$0xff]  }
  0x8f   :  { %3417 = vmatpush1.bf16.msra.mxu1 %v5080_v52  ;;  %v216_v52 = vpack.c.bf16 %v6159_v15, %v6159_v15  ;;  %v5164_v15 = vld [vmem:[%s7516_s1 + $0x310] ss:$8 sps:$4 sm:$0xff]  }
  0x90   :  { %3745 = vmatpush1.bf16.msra.mxu0 %v5083_v53  ;;  %3418 = vmatprep.subr.bf16.mxu1 %v5088_v54  ;;  %v232_v53 = vpack.c.bf16 %v6176_v40, %v6176_v40  ;;  %v5166_v54 = vld [vmem:[%s7516_s1 + $0x314] ss:$8 sps:$4 sm:$0xff]   ;;  %v5167_v40 = vld [vmem:[%s7516_s1 + $0xb10] ss:$8 sps:$4 sm:$0xff]  }
  0x91   :  { %3746 = vmatprep.subr.bf16.mxu0 %v5091_v55  ;;  %v5169_v55 = vld [vmem:[%s7516_s1 + $0xb14] ss:$8 sps:$4 sm:$0xff]  }
  0x93   :  { %3419 = vmatpush1.bf16.msra.mxu1 %v5086_v56  ;;  %v219_v56 = vpack.c.bf16 %v77_v47, %v77_v47  ;;  %v5244_v47 = vld [vmem:[%s7516_s1 + $0x3e4] ss:$8 sps:$4 sm:$0xff]  }
  0x94   :  { %3747 = vmatpush1.bf16.msra.mxu0 %v5089_v57  ;;  %3420 = vmatprep.subr.bf16.mxu1 %v5094_v58  ;;  %v235_v57 = vpack.c.bf16 %v145_v48, %v145_v48  ;;  %v5172_v58 = vld [vmem:[%s7516_s1 + $0x324] ss:$8 sps:$4 sm:$0xff]  }
  0x95   :  { %3748 = vmatprep.subr.bf16.mxu0 %v5097_v59  ;;  %v5175_v59 = vld [vmem:[%s7516_s1 + $0xb24] ss:$8 sps:$4 sm:$0xff]  }
  0x96   :  { %v5247_v48 = vld [vmem:[%s7516_s1 + $0xbe4] ss:$8 sps:$4 sm:$0xff]  }
  0x97   :  { %3421 = vmatpush1.bf16.msra.mxu1 %v5092_v60  ;;  %v5170_v60 = vld [vmem:[%s7516_s1 + $0x320] ss:$8 sps:$4 sm:$0xff]  }
  0x98   :  { %3749 = vmatpush1.bf16.msra.mxu0 %v5095_v61  ;;  %3422 = vmatprep.subr.bf16.mxu1 %v5100_v62  ;;  %v5173_v61 = vld [vmem:[%s7516_s1 + $0xb20] ss:$8 sps:$4 sm:$0xff]   ;;  %v5178_v62 = vld [vmem:[%s7516_s1 + $0x334] ss:$8 sps:$4 sm:$0xff]  }
  0x99   :  { %3750 = vmatprep.subr.bf16.mxu0 %v5103_v63  ;;  %v5181_v63 = vld [vmem:[%s7516_s1 + $0xb34] ss:$8 sps:$4 sm:$0xff]  }
  0x9b   :  { %3423 = vmatpush1.bf16.msra.mxu1 %v5098_v0  ;;  %v5176_v0 = vld [vmem:[%s7516_s1 + $0x330] ss:$8 sps:$4 sm:$0xff]  }
  0x9c   :  { %3751 = vmatpush1.bf16.msra.mxu0 %v5101_v1  ;;  %3424 = vmatprep.subr.bf16.mxu1 %v5106_v2  ;;  %v5179_v1 = vld [vmem:[%s7516_s1 + $0xb30] ss:$8 sps:$4 sm:$0xff]   ;;  %v5184_v2 = vld [vmem:[%s7516_s1 + $0x344] ss:$8 sps:$4 sm:$0xff]  }
  0x9d   :  { %3752 = vmatprep.subr.bf16.mxu0 %v5109_v3  ;;  %v5187_v3 = vld [vmem:[%s7516_s1 + $0xb44] ss:$8 sps:$4 sm:$0xff]  }
  0x9f   :  { %3425 = vmatpush1.bf16.msra.mxu1 %v5104_v4  ;;  %v5182_v4 = vld [vmem:[%s7516_s1 + $0x340] ss:$8 sps:$4 sm:$0xff]  }
  0xa0   :  { %3753 = vmatpush1.bf16.msra.mxu0 %v5107_v5  ;;  %3426 = vmatprep.subr.bf16.mxu1 %v5112_v6  ;;  %v5185_v5 = vld [vmem:[%s7516_s1 + $0xb40] ss:$8 sps:$4 sm:$0xff]   ;;  %v5190_v6 = vld [vmem:[%s7516_s1 + $0x354] ss:$8 sps:$4 sm:$0xff]  }
  0xa1   :  { %3754 = vmatprep.subr.bf16.mxu0 %v5115_v7  ;;  %v5193_v7 = vld [vmem:[%s7516_s1 + $0xb54] ss:$8 sps:$4 sm:$0xff]  }
  0xa3   :  { %3427 = vmatpush1.bf16.msra.mxu1 %v5110_v8  ;;  %v5188_v8 = vld [vmem:[%s7516_s1 + $0x350] ss:$8 sps:$4 sm:$0xff]  }
  0xa4   :  { %3755 = vmatpush1.bf16.msra.mxu0 %v5113_v9  ;;  %3428 = vmatprep.subr.bf16.mxu1 %v5118_v10  ;;  %v5191_v9 = vld [vmem:[%s7516_s1 + $0xb50] ss:$8 sps:$4 sm:$0xff]   ;;  %v5196_v10 = vld [vmem:[%s7516_s1 + $0x364] ss:$8 sps:$4 sm:$0xff]  }
  0xa5   :  { %3756 = vmatprep.subr.bf16.mxu0 %v5121_v11  ;;  %v5199_v11 = vld [vmem:[%s7516_s1 + $0xb64] ss:$8 sps:$4 sm:$0xff]  }
  0xa7   :  { %3429 = vmatpush1.bf16.msra.mxu1 %v5116_v12  ;;  %v5194_v12 = vld [vmem:[%s7516_s1 + $0x360] ss:$8 sps:$4 sm:$0xff]  }
  0xa8   :  { %3757 = vmatpush1.bf16.msra.mxu0 %v5119_v13  ;;  %3430 = vmatprep.subr.bf16.mxu1 %v5124_v16  ;;  %v5197_v13 = vld [vmem:[%s7516_s1 + $0xb60] ss:$8 sps:$4 sm:$0xff]   ;;  %v5202_v16 = vld [vmem:[%s7516_s1 + $0x374] ss:$8 sps:$4 sm:$0xff]  }
  0xa9   :  { %3758 = vmatprep.subr.bf16.mxu0 %v5127_v17  ;;  %v5205_v17 = vld [vmem:[%s7516_s1 + $0xb74] ss:$8 sps:$4 sm:$0xff]  }
  0xab   :  { %3431 = vmatpush1.bf16.msra.mxu1 %v5122_v18  ;;  %v5200_v18 = vld [vmem:[%s7516_s1 + $0x370] ss:$8 sps:$4 sm:$0xff]  }
  0xac   :  { %3759 = vmatpush1.bf16.msra.mxu0 %v5125_v19  ;;  %3432 = vmatprep.subr.bf16.mxu1 %v5130_v20  ;;  %v5203_v19 = vld [vmem:[%s7516_s1 + $0xb70] ss:$8 sps:$4 sm:$0xff]   ;;  %v5208_v20 = vld [vmem:[%s7516_s1 + $0x384] ss:$8 sps:$4 sm:$0xff]  }
  0xad   :  { %3760 = vmatprep.subr.bf16.mxu0 %v5133_v21  ;;  %v5211_v21 = vld [vmem:[%s7516_s1 + $0xb84] ss:$8 sps:$4 sm:$0xff]  }
  0xaf   :  { %3433 = vmatpush1.bf16.msra.mxu1 %v5128_v22  ;;  %v5206_v22 = vld [vmem:[%s7516_s1 + $0x380] ss:$8 sps:$4 sm:$0xff]  }
  0xb0   :  { %3761 = vmatpush1.bf16.msra.mxu0 %v5131_v23  ;;  %3434 = vmatprep.subr.bf16.mxu1 %v5136_v24  ;;  %v5209_v23 = vld [vmem:[%s7516_s1 + $0xb80] ss:$8 sps:$4 sm:$0xff]   ;;  %v5214_v24 = vld [vmem:[%s7516_s1 + $0x394] ss:$8 sps:$4 sm:$0xff]  }
  0xb1   :  { %3762 = vmatprep.subr.bf16.mxu0 %v5139_v25  ;;  %v5217_v25 = vld [vmem:[%s7516_s1 + $0xb94] ss:$8 sps:$4 sm:$0xff]  }
  0xb3   :  { %3435 = vmatpush1.bf16.msra.mxu1 %v5134_v26  ;;  %v5212_v26 = vld [vmem:[%s7516_s1 + $0x390] ss:$8 sps:$4 sm:$0xff]  }
  0xb4   :  { %3763 = vmatpush1.bf16.msra.mxu0 %v5137_v27  ;;  %3436 = vmatprep.subr.bf16.mxu1 %v5142_v28  ;;  %v5215_v27 = vld [vmem:[%s7516_s1 + $0xb90] ss:$8 sps:$4 sm:$0xff]   ;;  %v5220_v28 = vld [vmem:[%s7516_s1 + $0x3a4] ss:$8 sps:$4 sm:$0xff]  }
  0xb5   :  { %3764 = vmatprep.subr.bf16.mxu0 %v5145_v29  ;;  %v5223_v29 = vld [vmem:[%s7516_s1 + $0xba4] ss:$8 sps:$4 sm:$0xff]  }
  0xb7   :  { %3437 = vmatpush1.bf16.msra.mxu1 %v5140_v30  ;;  %v5218_v30 = vld [vmem:[%s7516_s1 + $0x3a0] ss:$8 sps:$4 sm:$0xff]  }
  0xb8   :  { %3765 = vmatpush1.bf16.msra.mxu0 %v5143_v31  ;;  %3438 = vmatprep.subr.bf16.mxu1 %v5148_v32  ;;  %v5221_v31 = vld [vmem:[%s7516_s1 + $0xba0] ss:$8 sps:$4 sm:$0xff]   ;;  %v5226_v32 = vld [vmem:[%s7516_s1 + $0x3b4] ss:$8 sps:$4 sm:$0xff]  }
  0xb9   :  { %3766 = vmatprep.subr.bf16.mxu0 %v5151_v33  ;;  %v5229_v33 = vld [vmem:[%s7516_s1 + $0xbb4] ss:$8 sps:$4 sm:$0xff]  }
  0xbb   :  { %3439 = vmatpush1.bf16.msra.mxu1 %v5146_v37  ;;  %v5232_v37 = vld [vmem:[%s7516_s1 + $0x3c4] ss:$8 sps:$4 sm:$0xff]  }
  0xbc   :  { %3767 = vmatpush1.bf16.msra.mxu0 %v5149_v38  ;;  %3440 = vmatprep.subr.bf16.mxu1 %v5154_v39  ;;  %v5235_v38 = vld [vmem:[%s7516_s1 + $0xbc4] ss:$8 sps:$4 sm:$0xff]   ;;  %v5230_v39 = vld [vmem:[%s7516_s1 + $0x3c0] ss:$8 sps:$4 sm:$0xff]  }
  0xbd   :  { %3768 = vmatprep.subr.bf16.mxu0 %v5157_v35  ;;  %v5233_v35 = vld [vmem:[%s7516_s1 + $0xbc0] ss:$8 sps:$4 sm:$0xff]  }
  0xbf   :  { %3441 = vmatpush1.bf16.msra.mxu1 %v5152_v42  ;;  %v5238_v42 = vld [vmem:[%s7516_s1 + $0x3d4] ss:$8 sps:$4 sm:$0xff]  }
  0xc0   :  { %3769 = vmatpush1.bf16.msra.mxu0 %v5155_v44  ;;  %3451 = vmatprep.subr.bf16.mxu1 %v5160_v45  ;;  %v5241_v44 = vld [vmem:[%s7516_s1 + $0xbd4] ss:$8 sps:$4 sm:$0xff]   ;;  %v5236_v45 = vld [vmem:[%s7516_s1 + $0x3d0] ss:$8 sps:$4 sm:$0xff]  }
  0xc1   :  { %3779 = vmatprep.subr.bf16.mxu0 %v5163_v46  ;;  %v5239_v46 = vld [vmem:[%s7516_s1 + $0xbd0] ss:$8 sps:$4 sm:$0xff]  }
  0xc2   :  { %3443 = vmatmul.mubr.bf16.vlgmr.msra.gmra.mrb[0].mxu1 %v216_v52  ;;  %v5242_v52 = vld [vmem:[%s7516_s1 + $0x3e0] ss:$8 sps:$4 sm:$0xff]  }
  0xc3   :  { %3771 = vmatmul.mubr.bf16.vlgmr.msra.gmra.mrb[0].mxu0 %v232_v53  ;;  %3452 = vmatpush1.bf16.msra.mxu1 %v5158_v50  ;;  %v6543_v50 = vld [vmem:[%s7517_s0 + $0x10] sm:$0xff]  ;;  %v5245_v53 = vld [vmem:[%s7516_s1 + $0xbe0] ss:$8 sps:$4 sm:$0xff]  }
  0xc4   :  { %3780 = vmatpush1.bf16.msra.mxu0 %v5161_v51  ;;  %3453 = vmatprep.subr.bf16.mxu1 %v5166_v54  ;;  %v6548_v51 = vld [vmem:[%s7517_s0 + $0x30] sm:$0xff] }
  0xc5   :  { %3781 = vmatprep.subr.bf16.mxu0 %v5169_v55  ;;  %3483 = vmatprep.mubr.bf16.mxu1 %v219_v56  ;;  %v5250_v54 = vld [vmem:[%s7516_s1 + $0x3f4] ss:$8 sps:$4 sm:$0xff]   ;;  %v6564_v56 = vrot.slane %v6543_v50, %v5852_v49 }
  0xc6   :  { %3811 = vmatprep.mubr.bf16.mxu0 %v235_v57  ;;  %v5253_v55 = vld [vmem:[%s7516_s1 + $0xbf4] ss:$8 sps:$4 sm:$0xff]   ;;  %v6568_v57 = vrot.slane %v6548_v51, %v5852_v49 }
  0xc7   :  { %3454 = vmatpush1.bf16.msra.mxu1 %v5164_v15  ;;  %v5248_v15 = vld [vmem:[%s7516_s1 + $0x3f0] ss:$8 sps:$4 sm:$0xff]  }
  0xc8   :  { %3782 = vmatpush1.bf16.msra.mxu0 %v5167_v40  ;;  %3455 = vmatprep.subr.bf16.mxu1 %v5172_v58  ;;  %v5251_v40 = vld [vmem:[%s7516_s1 + $0xbf0] ss:$8 sps:$4 sm:$0xff]   ;;  %v5257_v58 = vld [vmem:[%s7516_s1 + $0x404] ss:$8 sps:$4 sm:$0xff]  }
  0xc9   :  { %3783 = vmatprep.subr.bf16.mxu0 %v5175_v59  ;;  %v5261_v59 = vld [vmem:[%s7516_s1 + $0xc04] ss:$8 sps:$4 sm:$0xff]  }
  0xcb   :  { %3456 = vmatpush1.bf16.msra.mxu1 %v5170_v60  ;;  %v93_v60 = vcombine.high %v6564_v56, %v6564_v56 }
  0xcc   :  { %3784 = vmatpush1.bf16.msra.mxu0 %v5173_v61  ;;  %3457 = vmatprep.subr.bf16.mxu1 %v5178_v62  ;;  %v161_v61 = vcombine.high %v6568_v57, %v6568_v57  ;;  %v218_v62 = vpack.c.bf16 %v6347_v36, %v6347_v36  ;;  %v5267_v36 = vld [vmem:[%s7516_s1 + $0xc14] ss:$8 sps:$4 sm:$0xff]  }
  0xcd   :  { %3785 = vmatprep.subr.bf16.mxu0 %v5181_v63  ;;  %v234_v63 = vpack.c.bf16 %v6350_v41, %v6350_v41  ;;  %v221_v41 = vpack.c.bf16 %v93_v60, %v93_v60  ;;  %v5334_v60 = vld [vmem:[%s7516_s1 + $0x4d0] ss:$8 sps:$4 sm:$0xff]  }
  0xcf   :  { %3458 = vmatpush1.bf16.msra.mxu1 %v5176_v0  ;;  %v5255_v0 = vld [vmem:[%s7516_s1 + $0x400] ss:$8 sps:$4 sm:$0xff]  }
  0xd0   :  { %3786 = vmatpush1.bf16.msra.mxu0 %v5179_v1  ;;  %3459 = vmatprep.subr.bf16.mxu1 %v5184_v2  ;;  %v5259_v1 = vld [vmem:[%s7516_s1 + $0xc00] ss:$8 sps:$4 sm:$0xff]   ;;  %v5264_v2 = vld [vmem:[%s7516_s1 + $0x414] ss:$8 sps:$4 sm:$0xff]  }
  0xd1   :  { %3787 = vmatprep.subr.bf16.mxu0 %v5187_v3  ;;  %v237_v3 = vpack.c.bf16 %v161_v61, %v161_v61  ;;  %v5337_v61 = vld [vmem:[%s7516_s1 + $0xcd0] ss:$8 sps:$4 sm:$0xff]  }
  0xd3   :  { %3460 = vmatpush1.bf16.msra.mxu1 %v5182_v4  ;;  %v5262_v4 = vld [vmem:[%s7516_s1 + $0x410] ss:$8 sps:$4 sm:$0xff]  }
  0xd4   :  { %3788 = vmatpush1.bf16.msra.mxu0 %v5185_v5  ;;  %3461 = vmatprep.subr.bf16.mxu1 %v5190_v6  ;;  %v5265_v5 = vld [vmem:[%s7516_s1 + $0xc10] ss:$8 sps:$4 sm:$0xff]   ;;  %v5270_v6 = vld [vmem:[%s7516_s1 + $0x424] ss:$8 sps:$4 sm:$0xff]  }
  0xd5   :  { %3789 = vmatprep.subr.bf16.mxu0 %v5193_v7  ;;  %v5273_v7 = vld [vmem:[%s7516_s1 + $0xc24] ss:$8 sps:$4 sm:$0xff]  }
  0xd7   :  { %3462 = vmatpush1.bf16.msra.mxu1 %v5188_v8  ;;  %v5268_v8 = vld [vmem:[%s7516_s1 + $0x420] ss:$8 sps:$4 sm:$0xff]  }
  0xd8   :  { %3790 = vmatpush1.bf16.msra.mxu0 %v5191_v9  ;;  %3463 = vmatprep.subr.bf16.mxu1 %v5196_v10  ;;  %v5271_v9 = vld [vmem:[%s7516_s1 + $0xc20] ss:$8 sps:$4 sm:$0xff]   ;;  %v5276_v10 = vld [vmem:[%s7516_s1 + $0x434] ss:$8 sps:$4 sm:$0xff]  }
  0xd9   :  { %3791 = vmatprep.subr.bf16.mxu0 %v5199_v11  ;;  %v5279_v11 = vld [vmem:[%s7516_s1 + $0xc34] ss:$8 sps:$4 sm:$0xff]  }
  0xdb   :  { %3464 = vmatpush1.bf16.msra.mxu1 %v5194_v12  ;;  %v5274_v12 = vld [vmem:[%s7516_s1 + $0x430] ss:$8 sps:$4 sm:$0xff]  }
  0xdc   :  { %3792 = vmatpush1.bf16.msra.mxu0 %v5197_v13  ;;  %3465 = vmatprep.subr.bf16.mxu1 %v5202_v16  ;;  %v5277_v13 = vld [vmem:[%s7516_s1 + $0xc30] ss:$8 sps:$4 sm:$0xff]   ;;  %v5282_v16 = vld [vmem:[%s7516_s1 + $0x444] ss:$8 sps:$4 sm:$0xff]  }
  0xdd   :  { %3793 = vmatprep.subr.bf16.mxu0 %v5205_v17  ;;  %v5285_v17 = vld [vmem:[%s7516_s1 + $0xc44] ss:$8 sps:$4 sm:$0xff]  }
  0xdf   :  { %3466 = vmatpush1.bf16.msra.mxu1 %v5200_v18  ;;  %v5280_v18 = vld [vmem:[%s7516_s1 + $0x440] ss:$8 sps:$4 sm:$0xff]  }
  0xe0   :  { %3794 = vmatpush1.bf16.msra.mxu0 %v5203_v19  ;;  %3467 = vmatprep.subr.bf16.mxu1 %v5208_v20  ;;  %v5283_v19 = vld [vmem:[%s7516_s1 + $0xc40] ss:$8 sps:$4 sm:$0xff]   ;;  %v5288_v20 = vld [vmem:[%s7516_s1 + $0x454] ss:$8 sps:$4 sm:$0xff]  }
  0xe1   :  { %3795 = vmatprep.subr.bf16.mxu0 %v5211_v21  ;;  %v5291_v21 = vld [vmem:[%s7516_s1 + $0xc54] ss:$8 sps:$4 sm:$0xff]  }
  0xe3   :  { %3468 = vmatpush1.bf16.msra.mxu1 %v5206_v22  ;;  %v5286_v22 = vld [vmem:[%s7516_s1 + $0x450] ss:$8 sps:$4 sm:$0xff]  }
  0xe4   :  { %3796 = vmatpush1.bf16.msra.mxu0 %v5209_v23  ;;  %3469 = vmatprep.subr.bf16.mxu1 %v5214_v24  ;;  %v5289_v23 = vld [vmem:[%s7516_s1 + $0xc50] ss:$8 sps:$4 sm:$0xff]   ;;  %v5294_v24 = vld [vmem:[%s7516_s1 + $0x464] ss:$8 sps:$4 sm:$0xff]  }
  0xe5   :  { %3797 = vmatprep.subr.bf16.mxu0 %v5217_v25  ;;  %v5297_v25 = vld [vmem:[%s7516_s1 + $0xc64] ss:$8 sps:$4 sm:$0xff]  }
  0xe7   :  { %3470 = vmatpush1.bf16.msra.mxu1 %v5212_v26  ;;  %v5292_v26 = vld [vmem:[%s7516_s1 + $0x460] ss:$8 sps:$4 sm:$0xff]  }
  0xe8   :  { %3798 = vmatpush1.bf16.msra.mxu0 %v5215_v27  ;;  %3471 = vmatprep.subr.bf16.mxu1 %v5220_v28  ;;  %v5295_v27 = vld [vmem:[%s7516_s1 + $0xc60] ss:$8 sps:$4 sm:$0xff]   ;;  %v5300_v28 = vld [vmem:[%s7516_s1 + $0x474] ss:$8 sps:$4 sm:$0xff]  }
  0xe9   :  { %3799 = vmatprep.subr.bf16.mxu0 %v5223_v29  ;;  %v5303_v29 = vld [vmem:[%s7516_s1 + $0xc74] ss:$8 sps:$4 sm:$0xff]  }
  0xeb   :  { %3472 = vmatpush1.bf16.msra.mxu1 %v5218_v30  ;;  %v5298_v30 = vld [vmem:[%s7516_s1 + $0x470] ss:$8 sps:$4 sm:$0xff]  }
  0xec   :  { %3800 = vmatpush1.bf16.msra.mxu0 %v5221_v31  ;;  %3473 = vmatprep.subr.bf16.mxu1 %v5226_v32  ;;  %v5301_v31 = vld [vmem:[%s7516_s1 + $0xc70] ss:$8 sps:$4 sm:$0xff]   ;;  %v5306_v32 = vld [vmem:[%s7516_s1 + $0x484] ss:$8 sps:$4 sm:$0xff]  }
  0xed   :  { %3801 = vmatprep.subr.bf16.mxu0 %v5229_v33  ;;  %v5309_v33 = vld [vmem:[%s7516_s1 + $0xc84] ss:$8 sps:$4 sm:$0xff]  }
  0xef   :  { %3474 = vmatpush1.bf16.msra.mxu1 %v5224_v34  ;;  %v5304_v34 = vld [vmem:[%s7516_s1 + $0x480] ss:$8 sps:$4 sm:$0xff]  }
  0xf0   :  { %3802 = vmatpush1.bf16.msra.mxu0 %v5227_v14  ;;  %3475 = vmatprep.subr.bf16.mxu1 %v5232_v37  ;;  %v5307_v14 = vld [vmem:[%s7516_s1 + $0xc80] ss:$8 sps:$4 sm:$0xff]   ;;  %v5312_v37 = vld [vmem:[%s7516_s1 + $0x494] ss:$8 sps:$4 sm:$0xff]  }
  0xf1   :  { %3803 = vmatprep.subr.bf16.mxu0 %v5235_v38  ;;  %v5315_v38 = vld [vmem:[%s7516_s1 + $0xc94] ss:$8 sps:$4 sm:$0xff]  }
  0xf3   :  { %3476 = vmatpush1.bf16.msra.mxu1 %v5230_v39  ;;  %v5310_v39 = vld [vmem:[%s7516_s1 + $0x490] ss:$8 sps:$4 sm:$0xff]  }
  0xf4   :  { %3804 = vmatpush1.bf16.msra.mxu0 %v5233_v35  ;;  %3477 = vmatprep.subr.bf16.mxu1 %v5238_v42  ;;  %v5313_v35 = vld [vmem:[%s7516_s1 + $0xc90] ss:$8 sps:$4 sm:$0xff]   ;;  %v5318_v42 = vld [vmem:[%s7516_s1 + $0x4a4] ss:$8 sps:$4 sm:$0xff]  }
  0xf5   :  { %3805 = vmatprep.subr.bf16.mxu0 %v5241_v44  ;;  %v5321_v44 = vld [vmem:[%s7516_s1 + $0xca4] ss:$8 sps:$4 sm:$0xff]  }
  0xf7   :  { %3478 = vmatpush1.bf16.msra.mxu1 %v5236_v45  ;;  %v5316_v45 = vld [vmem:[%s7516_s1 + $0x4a0] ss:$8 sps:$4 sm:$0xff]  }
  0xf8   :  { %3806 = vmatpush1.bf16.msra.mxu0 %v5239_v46  ;;  %3479 = vmatprep.subr.bf16.mxu1 %v5244_v47  ;;  %v5319_v46 = vld [vmem:[%s7516_s1 + $0xca0] ss:$8 sps:$4 sm:$0xff]   ;;  %v5324_v47 = vld [vmem:[%s7516_s1 + $0x4b4] ss:$8 sps:$4 sm:$0xff]  }
  0xf9   :  { %3807 = vmatprep.subr.bf16.mxu0 %v5247_v48  ;;  %v5327_v48 = vld [vmem:[%s7516_s1 + $0xcb4] ss:$8 sps:$4 sm:$0xff]  }
  0xfb   :  { %3480 = vmatpush1.bf16.msra.mxu1 %v5242_v52  ;;  %v5322_v52 = vld [vmem:[%s7516_s1 + $0x4b0] ss:$8 sps:$4 sm:$0xff]  }
  0xfc   :  { %3808 = vmatpush1.bf16.msra.mxu0 %v5245_v53  ;;  %3481 = vmatprep.subr.bf16.mxu1 %v5250_v54  ;;  %v5325_v53 = vld [vmem:[%s7516_s1 + $0xcb0] ss:$8 sps:$4 sm:$0xff]   ;;  %v5330_v54 = vld [vmem:[%s7516_s1 + $0x4c4] ss:$8 sps:$4 sm:$0xff]  }
  0xfd   :  { %3809 = vmatprep.subr.bf16.mxu0 %v5253_v55  ;;  %v5333_v55 = vld [vmem:[%s7516_s1 + $0xcc4] ss:$8 sps:$4 sm:$0xff]  }
  0xff   :  { %3482 = vmatpush1.bf16.msra.mxu1 %v5248_v15  ;;  %v5328_v15 = vld [vmem:[%s7516_s1 + $0x4c0] ss:$8 sps:$4 sm:$0xff]  }
 0x100   :  { %3810 = vmatpush1.bf16.msra.mxu0 %v5251_v40  ;;  %3492 = vmatprep.subr.bf16.mxu1 %v5257_v58  ;;  %v5331_v40 = vld [vmem:[%s7516_s1 + $0xcc0] ss:$8 sps:$4 sm:$0xff]   ;;  %v5336_v58 = vld [vmem:[%s7516_s1 + $0x4d4] ss:$8 sps:$4 sm:$0xff]  }
 0x101   :  { %3820 = vmatprep.subr.bf16.mxu0 %v5261_v59  ;;  %v5339_v59 = vld [vmem:[%s7516_s1 + $0xcd4] ss:$8 sps:$4 sm:$0xff]  }
 0x102   :  { %3484 = vmatmul.mubr.bf16.vlgmr.msra.gmra.mrb[0].mxu1 %v218_v62  ;;  %v5342_v62 = vld [vmem:[%s7516_s1 + $0x4e4] ss:$8 sps:$4 sm:$0xff]  }
 0x103   :  { %3812 = vmatmul.mubr.bf16.vlgmr.msra.gmra.mrb[0].mxu0 %v234_v63  ;;  %3493 = vmatpush1.bf16.msra.mxu1 %v5255_v0  ;;  %v5345_v63 = vld [vmem:[%s7516_s1 + $0xce4] ss:$8 sps:$4 sm:$0xff]   ;;  %v78_v0 = vcombine.high %v6543_v50, %v6543_v50  ;;  %v5351_v50 = vld [vmem:[%s7516_s1 + $0xcf4] ss:$8 sps:$4 sm:$0xff]  }
 0x104   :  { %3821 = vmatpush1.bf16.msra.mxu0 %v5259_v1  ;;  %3494 = vmatprep.subr.bf16.mxu1 %v5264_v2  ;;  %v146_v1 = vcombine.high %v6548_v51, %v6548_v51  ;;  %v5340_v2 = vld [vmem:[%s7516_s1 + $0x4e0] ss:$8 sps:$4 sm:$0xff]  }
 0x105   :  { %3822 = vmatprep.subr.bf16.mxu0 %v5267_v36  ;;  %3524 = vmatprep.mubr.bf16.mxu1 %v221_v41  ;;  %v5343_v36 = vld [vmem:[%s7516_s1 + $0xce0] ss:$8 sps:$4 sm:$0xff]   ;;  %v5348_v41 = vld [vmem:[%s7516_s1 + $0x4f4] ss:$8 sps:$4 sm:$0xff]   ;;  %v6775_v51 = vrot.slane %v78_v0, %v5852_v49  ;;  %v5418_v0 = vld [vmem:[%s7516_s1 + $0x5b0] ss:$8 sps:$4 sm:$0xff]  }
 0x106   :  { %3852 = vmatprep.mubr.bf16.mxu0 %v237_v3  ;;  %v6778_v3 = vrot.slane %v146_v1, %v5852_v49  ;;  %v5421_v1 = vld [vmem:[%s7516_s1 + $0xdb0] ss:$8 sps:$4 sm:$0xff]  }
 0x107   :  { %3495 = vmatpush1.bf16.msra.mxu1 %v5262_v4  ;;  %v5346_v4 = vld [vmem:[%s7516_s1 + $0x4f0] ss:$8 sps:$4 sm:$0xff]  }
 0x108   :  { %3823 = vmatpush1.bf16.msra.mxu0 %v5265_v5  ;;  %3496 = vmatprep.subr.bf16.mxu1 %v5270_v6  ;;  %v5349_v5 = vld [vmem:[%s7516_s1 + $0xcf0] ss:$8 sps:$4 sm:$0xff]   ;;  %v5354_v6 = vld [vmem:[%s7516_s1 + $0x504] ss:$8 sps:$4 sm:$0xff]  }
 0x109   :  { %3824 = vmatprep.subr.bf16.mxu0 %v5273_v7  ;;  %v5357_v7 = vld [vmem:[%s7516_s1 + $0xd04] ss:$8 sps:$4 sm:$0xff]  }
 0x10b   :  { %3497 = vmatpush1.bf16.msra.mxu1 %v5268_v8  ;;  %v94_v8 = vcombine.high %v6775_v51, %v6775_v51 }
 0x10c   :  { %3825 = vmatpush1.bf16.msra.mxu0 %v5271_v9  ;;  %3498 = vmatprep.subr.bf16.mxu1 %v5276_v10  ;;  %v162_v9 = vcombine.high %v6778_v3, %v6778_v3  ;;  %v220_v10 = vpack.c.bf16 %v6564_v56, %v6564_v56  ;;  %v5363_v56 = vld [vmem:[%s7516_s1 + $0xd14] ss:$8 sps:$4 sm:$0xff]  }
 0x10d   :  { %3826 = vmatprep.subr.bf16.mxu0 %v5279_v11  ;;  %v236_v11 = vpack.c.bf16 %v6568_v57, %v6568_v57  ;;  %v223_v57 = vpack.c.bf16 %v94_v8, %v94_v8  ;;  %v5438_v8 = vld [vmem:[%s7516_s1 + $0x5e4] ss:$8 sps:$4 sm:$0xff]  }
 0x10f   :  { %3499 = vmatpush1.bf16.msra.mxu1 %v5274_v12  ;;  %v5352_v12 = vld [vmem:[%s7516_s1 + $0x500] ss:$8 sps:$4 sm:$0xff]  }
 0x110   :  { %3827 = vmatpush1.bf16.msra.mxu0 %v5277_v13  ;;  %3500 = vmatprep.subr.bf16.mxu1 %v5282_v16  ;;  %v5355_v13 = vld [vmem:[%s7516_s1 + $0xd00] ss:$8 sps:$4 sm:$0xff]   ;;  %v5360_v16 = vld [vmem:[%s7516_s1 + $0x514] ss:$8 sps:$4 sm:$0xff]  }
 0x111   :  { %3828 = vmatprep.subr.bf16.mxu0 %v5285_v17  ;;  %v239_v17 = vpack.c.bf16 %v162_v9, %v162_v9  ;;  %v5441_v9 = vld [vmem:[%s7516_s1 + $0xde4] ss:$8 sps:$4 sm:$0xff]  }
 0x113   :  { %3501 = vmatpush1.bf16.msra.mxu1 %v5280_v18  ;;  %v5358_v18 = vld [vmem:[%s7516_s1 + $0x510] ss:$8 sps:$4 sm:$0xff]  }
 0x114   :  { %3829 = vmatpush1.bf16.msra.mxu0 %v5283_v19  ;;  %3502 = vmatprep.subr.bf16.mxu1 %v5288_v20  ;;  %v5361_v19 = vld [vmem:[%s7516_s1 + $0xd10] ss:$8 sps:$4 sm:$0xff]   ;;  %v5366_v20 = vld [vmem:[%s7516_s1 + $0x524] ss:$8 sps:$4 sm:$0xff]  }
 0x115   :  { %3830 = vmatprep.subr.bf16.mxu0 %v5291_v21  ;;  %v5369_v21 = vld [vmem:[%s7516_s1 + $0xd24] ss:$8 sps:$4 sm:$0xff]  }
 0x117   :  { %3503 = vmatpush1.bf16.msra.mxu1 %v5286_v22  ;;  %v5364_v22 = vld [vmem:[%s7516_s1 + $0x520] ss:$8 sps:$4 sm:$0xff]  }
 0x118   :  { %3831 = vmatpush1.bf16.msra.mxu0 %v5289_v23  ;;  %3504 = vmatprep.subr.bf16.mxu1 %v5294_v24  ;;  %v5367_v23 = vld [vmem:[%s7516_s1 + $0xd20] ss:$8 sps:$4 sm:$0xff]   ;;  %v5372_v24 = vld [vmem:[%s7516_s1 + $0x534] ss:$8 sps:$4 sm:$0xff]  }
 0x119   :  { %3832 = vmatprep.subr.bf16.mxu0 %v5297_v25  ;;  %v5375_v25 = vld [vmem:[%s7516_s1 + $0xd34] ss:$8 sps:$4 sm:$0xff]  }
 0x11b   :  { %3505 = vmatpush1.bf16.msra.mxu1 %v5292_v26  ;;  %v5370_v26 = vld [vmem:[%s7516_s1 + $0x530] ss:$8 sps:$4 sm:$0xff]  }
 0x11c   :  { %3833 = vmatpush1.bf16.msra.mxu0 %v5295_v27  ;;  %3506 = vmatprep.subr.bf16.mxu1 %v5300_v28  ;;  %v5373_v27 = vld [vmem:[%s7516_s1 + $0xd30] ss:$8 sps:$4 sm:$0xff]   ;;  %v5378_v28 = vld [vmem:[%s7516_s1 + $0x544] ss:$8 sps:$4 sm:$0xff]  }
 0x11d   :  { %3834 = vmatprep.subr.bf16.mxu0 %v5303_v29  ;;  %v5381_v29 = vld [vmem:[%s7516_s1 + $0xd44] ss:$8 sps:$4 sm:$0xff]  }
 0x11f   :  { %3507 = vmatpush1.bf16.msra.mxu1 %v5298_v30  ;;  %v5376_v30 = vld [vmem:[%s7516_s1 + $0x540] ss:$8 sps:$4 sm:$0xff]  }
 0x120   :  { %3835 = vmatpush1.bf16.msra.mxu0 %v5301_v31  ;;  %3508 = vmatprep.subr.bf16.mxu1 %v5306_v32  ;;  %v5379_v31 = vld [vmem:[%s7516_s1 + $0xd40] ss:$8 sps:$4 sm:$0xff]   ;;  %v5384_v32 = vld [vmem:[%s7516_s1 + $0x554] ss:$8 sps:$4 sm:$0xff]  }
 0x121   :  { %3836 = vmatprep.subr.bf16.mxu0 %v5309_v33  ;;  %v5387_v33 = vld [vmem:[%s7516_s1 + $0xd54] ss:$8 sps:$4 sm:$0xff]  }
 0x123   :  { %3509 = vmatpush1.bf16.msra.mxu1 %v5304_v34  ;;  %v5382_v34 = vld [vmem:[%s7516_s1 + $0x550] ss:$8 sps:$4 sm:$0xff]  }
 0x124   :  { %3837 = vmatpush1.bf16.msra.mxu0 %v5307_v14  ;;  %3510 = vmatprep.subr.bf16.mxu1 %v5312_v37  ;;  %v5385_v14 = vld [vmem:[%s7516_s1 + $0xd50] ss:$8 sps:$4 sm:$0xff]   ;;  %v5390_v37 = vld [vmem:[%s7516_s1 + $0x564] ss:$8 sps:$4 sm:$0xff]  }
 0x125   :  { %3838 = vmatprep.subr.bf16.mxu0 %v5315_v38  ;;  %v5393_v38 = vld [vmem:[%s7516_s1 + $0xd64] ss:$8 sps:$4 sm:$0xff]  }
 0x127   :  { %3511 = vmatpush1.bf16.msra.mxu1 %v5310_v39  ;;  %v5388_v39 = vld [vmem:[%s7516_s1 + $0x560] ss:$8 sps:$4 sm:$0xff]  }
 0x128   :  { %3839 = vmatpush1.bf16.msra.mxu0 %v5313_v35  ;;  %3512 = vmatprep.subr.bf16.mxu1 %v5318_v42  ;;  %v5391_v35 = vld [vmem:[%s7516_s1 + $0xd60] ss:$8 sps:$4 sm:$0xff]   ;;  %v5396_v42 = vld [vmem:[%s7516_s1 + $0x574] ss:$8 sps:$4 sm:$0xff]  }
 0x129   :  { %3840 = vmatprep.subr.bf16.mxu0 %v5321_v44  ;;  %v5399_v44 = vld [vmem:[%s7516_s1 + $0xd74] ss:$8 sps:$4 sm:$0xff]  }
 0x12b   :  { %3513 = vmatpush1.bf16.msra.mxu1 %v5316_v45  ;;  %v5394_v45 = vld [vmem:[%s7516_s1 + $0x570] ss:$8 sps:$4 sm:$0xff]  }
 0x12c   :  { %3841 = vmatpush1.bf16.msra.mxu0 %v5319_v46  ;;  %3514 = vmatprep.subr.bf16.mxu1 %v5324_v47  ;;  %v5397_v46 = vld [vmem:[%s7516_s1 + $0xd70] ss:$8 sps:$4 sm:$0xff]   ;;  %v5402_v47 = vld [vmem:[%s7516_s1 + $0x584] ss:$8 sps:$4 sm:$0xff]  }
 0x12d   :  { %3842 = vmatprep.subr.bf16.mxu0 %v5327_v48  ;;  %v5405_v48 = vld [vmem:[%s7516_s1 + $0xd84] ss:$8 sps:$4 sm:$0xff]  }
 0x12f   :  { %3515 = vmatpush1.bf16.msra.mxu1 %v5322_v52  ;;  %v5400_v52 = vld [vmem:[%s7516_s1 + $0x580] ss:$8 sps:$4 sm:$0xff]  }
 0x130   :  { %3843 = vmatpush1.bf16.msra.mxu0 %v5325_v53  ;;  %3516 = vmatprep.subr.bf16.mxu1 %v5330_v54  ;;  %v5403_v53 = vld [vmem:[%s7516_s1 + $0xd80] ss:$8 sps:$4 sm:$0xff]   ;;  %v5408_v54 = vld [vmem:[%s7516_s1 + $0x594] ss:$8 sps:$4 sm:$0xff]  }
 0x131   :  { %3844 = vmatprep.subr.bf16.mxu0 %v5333_v55  ;;  %v5411_v55 = vld [vmem:[%s7516_s1 + $0xd94] ss:$8 sps:$4 sm:$0xff]  }
 0x133   :  { %3517 = vmatpush1.bf16.msra.mxu1 %v5328_v15  ;;  %v5406_v15 = vld [vmem:[%s7516_s1 + $0x590] ss:$8 sps:$4 sm:$0xff]  }
 0x134   :  { %3845 = vmatpush1.bf16.msra.mxu0 %v5331_v40  ;;  %3518 = vmatprep.subr.bf16.mxu1 %v5336_v58  ;;  %v5409_v40 = vld [vmem:[%s7516_s1 + $0xd90] ss:$8 sps:$4 sm:$0xff]   ;;  %v5414_v58 = vld [vmem:[%s7516_s1 + $0x5a4] ss:$8 sps:$4 sm:$0xff]  }
 0x135   :  { %3846 = vmatprep.subr.bf16.mxu0 %v5339_v59  ;;  %v5417_v59 = vld [vmem:[%s7516_s1 + $0xda4] ss:$8 sps:$4 sm:$0xff]  }
 0x137   :  { %3519 = vmatpush1.bf16.msra.mxu1 %v5334_v60  ;;  %v5412_v60 = vld [vmem:[%s7516_s1 + $0x5a0] ss:$8 sps:$4 sm:$0xff]  }
 0x138   :  { %3847 = vmatpush1.bf16.msra.mxu0 %v5337_v61  ;;  %3520 = vmatprep.subr.bf16.mxu1 %v5342_v62  ;;  %v5415_v61 = vld [vmem:[%s7516_s1 + $0xda0] ss:$8 sps:$4 sm:$0xff]   ;;  %v5420_v62 = vld [vmem:[%s7516_s1 + $0x5b4] ss:$8 sps:$4 sm:$0xff]  }
 0x139   :  { %3848 = vmatprep.subr.bf16.mxu0 %v5345_v63  ;;  %v5423_v63 = vld [vmem:[%s7516_s1 + $0xdb4] ss:$8 sps:$4 sm:$0xff]  }
 0x13b   :  { %3521 = vmatpush1.bf16.msra.mxu1 %v5340_v2  ;;  %v5426_v2 = vld [vmem:[%s7516_s1 + $0x5c4] ss:$8 sps:$4 sm:$0xff]  }
 0x13c   :  { %3849 = vmatpush1.bf16.msra.mxu0 %v5343_v36  ;;  %3522 = vmatprep.subr.bf16.mxu1 %v5348_v41  ;;  %v5429_v36 = vld [vmem:[%s7516_s1 + $0xdc4] ss:$8 sps:$4 sm:$0xff]   ;;  %v5424_v41 = vld [vmem:[%s7516_s1 + $0x5c0] ss:$8 sps:$4 sm:$0xff]  }
 0x13d   :  { %3850 = vmatprep.subr.bf16.mxu0 %v5351_v50  ;;  %v5427_v50 = vld [vmem:[%s7516_s1 + $0xdc0] ss:$8 sps:$4 sm:$0xff]  }
 0x13f   :  { %3523 = vmatpush1.bf16.msra.mxu1 %v5346_v4  ;;  %v5432_v4 = vld [vmem:[%s7516_s1 + $0x5d4] ss:$8 sps:$4 sm:$0xff]  }
 0x140   :  { %3851 = vmatpush1.bf16.msra.mxu0 %v5349_v5  ;;  %3533 = vmatprep.subr.bf16.mxu1 %v5354_v6  ;;  %v5435_v5 = vld [vmem:[%s7516_s1 + $0xdd4] ss:$8 sps:$4 sm:$0xff]   ;;  %v5430_v6 = vld [vmem:[%s7516_s1 + $0x5d0] ss:$8 sps:$4 sm:$0xff]  }
 0x141   :  { %3861 = vmatprep.subr.bf16.mxu0 %v5357_v7  ;;  %v5433_v7 = vld [vmem:[%s7516_s1 + $0xdd0] ss:$8 sps:$4 sm:$0xff]  }
 0x142   :  { %3525 = vmatmul.mubr.bf16.vlgmr.msra.gmra.mrb[0].mxu1 %v220_v10  ;;  %v6971_v10 = vld [vmem:[%s7517_s0 + $0x18] sm:$0xff] }
 0x143   :  { %3853 = vmatmul.mubr.bf16.vlgmr.msra.gmra.mrb[0].mxu0 %v236_v11  ;;  %3534 = vmatpush1.bf16.msra.mxu1 %v5352_v12  ;;  %v6976_v11 = vld [vmem:[%s7517_s0 + $0x38] sm:$0xff]  ;;  %v5436_v12 = vld [vmem:[%s7516_s1 + $0x5e0] ss:$8 sps:$4 sm:$0xff]  }
 0x144   :  { %3862 = vmatpush1.bf16.msra.mxu0 %v5355_v13  ;;  %3535 = vmatprep.subr.bf16.mxu1 %v5360_v16  ;;  %v5439_v13 = vld [vmem:[%s7516_s1 + $0xde0] ss:$8 sps:$4 sm:$0xff]   ;;  %v5444_v16 = vld [vmem:[%s7516_s1 + $0x5f4] ss:$8 sps:$4 sm:$0xff]  }
 0x145   :  { %3863 = vmatprep.subr.bf16.mxu0 %v5363_v56  ;;  %3565 = vmatprep.mubr.bf16.mxu1 %v223_v57  ;;  %v5447_v56 = vld [vmem:[%s7516_s1 + $0xdf4] ss:$8 sps:$4 sm:$0xff]   ;;  %v6992_v57 = vrot.slane %v6971_v10, %v5852_v49 }
 0x146   :  { %3893 = vmatprep.mubr.bf16.mxu0 %v239_v17  ;;  %v6996_v17 = vrot.slane %v6976_v11, %v5852_v49 }
 0x147   :  { %3536 = vmatpush1.bf16.msra.mxu1 %v5358_v18  ;;  %v5442_v18 = vld [vmem:[%s7516_s1 + $0x5f0] ss:$8 sps:$4 sm:$0xff]  }
 0x148   :  { %3864 = vmatpush1.bf16.msra.mxu0 %v5361_v19  ;;  %3537 = vmatprep.subr.bf16.mxu1 %v5366_v20  ;;  %v5445_v19 = vld [vmem:[%s7516_s1 + $0xdf0] ss:$8 sps:$4 sm:$0xff]   ;;  %v5451_v20 = vld [vmem:[%s7516_s1 + $0x604] ss:$8 sps:$4 sm:$0xff]  }
 0x149   :  { %3865 = vmatprep.subr.bf16.mxu0 %v5369_v21  ;;  %v5455_v21 = vld [vmem:[%s7516_s1 + $0xe04] ss:$8 sps:$4 sm:$0xff]  }
 0x14b   :  { %3538 = vmatpush1.bf16.msra.mxu1 %v5364_v22  ;;  %v110_v22 = vcombine.high %v6992_v57, %v6992_v57 }
 0x14c   :  { %3866 = vmatpush1.bf16.msra.mxu0 %v5367_v23  ;;  %3539 = vmatprep.subr.bf16.mxu1 %v5372_v24  ;;  %v178_v23 = vcombine.high %v6996_v17, %v6996_v17  ;;  %v222_v24 = vpack.c.bf16 %v6775_v51, %v6775_v51  ;;  %v5461_v51 = vld [vmem:[%s7516_s1 + $0xe14] ss:$8 sps:$4 sm:$0xff]  }
 0x14d   :  { %3867 = vmatprep.subr.bf16.mxu0 %v5375_v25  ;;  %v238_v25 = vpack.c.bf16 %v6778_v3, %v6778_v3  ;;  %v225_v3 = vpack.c.bf16 %v110_v22, %v110_v22  ;;  %v5528_v22 = vld [vmem:[%s7516_s1 + $0x6d0] ss:$8 sps:$4 sm:$0xff]  }
 0x14f   :  { %3540 = vmatpush1.bf16.msra.mxu1 %v5370_v26  ;;  %v5449_v26 = vld [vmem:[%s7516_s1 + $0x600] ss:$8 sps:$4 sm:$0xff]  }
 0x150   :  { %3868 = vmatpush1.bf16.msra.mxu0 %v5373_v27  ;;  %3541 = vmatprep.subr.bf16.mxu1 %v5378_v28  ;;  %v5453_v27 = vld [vmem:[%s7516_s1 + $0xe00] ss:$8 sps:$4 sm:$0xff]   ;;  %v5458_v28 = vld [vmem:[%s7516_s1 + $0x614] ss:$8 sps:$4 sm:$0xff]  }
 0x151   :  { %3869 = vmatprep.subr.bf16.mxu0 %v5381_v29  ;;  %v241_v29 = vpack.c.bf16 %v178_v23, %v178_v23  ;;  %v5531_v23 = vld [vmem:[%s7516_s1 + $0xed0] ss:$8 sps:$4 sm:$0xff]  }
 0x153   :  { %3542 = vmatpush1.bf16.msra.mxu1 %v5376_v30  ;;  %v5456_v30 = vld [vmem:[%s7516_s1 + $0x610] ss:$8 sps:$4 sm:$0xff]  }
 0x154   :  { %3870 = vmatpush1.bf16.msra.mxu0 %v5379_v31  ;;  %3543 = vmatprep.subr.bf16.mxu1 %v5384_v32  ;;  %v5459_v31 = vld [vmem:[%s7516_s1 + $0xe10] ss:$8 sps:$4 sm:$0xff]   ;;  %v5464_v32 = vld [vmem:[%s7516_s1 + $0x624] ss:$8 sps:$4 sm:$0xff]  }
 0x155   :  { %3871 = vmatprep.subr.bf16.mxu0 %v5387_v33  ;;  %v5467_v33 = vld [vmem:[%s7516_s1 + $0xe24] ss:$8 sps:$4 sm:$0xff]  }
 0x157   :  { %3544 = vmatpush1.bf16.msra.mxu1 %v5382_v34  ;;  %v5462_v34 = vld [vmem:[%s7516_s1 + $0x620] ss:$8 sps:$4 sm:$0xff]  }
 0x158   :  { %3872 = vmatpush1.bf16.msra.mxu0 %v5385_v14  ;;  %3545 = vmatprep.subr.bf16.mxu1 %v5390_v37  ;;  %v5465_v14 = vld [vmem:[%s7516_s1 + $0xe20] ss:$8 sps:$4 sm:$0xff]   ;;  %v5470_v37 = vld [vmem:[%s7516_s1 + $0x634] ss:$8 sps:$4 sm:$0xff]  }
 0x159   :  { %3873 = vmatprep.subr.bf16.mxu0 %v5393_v38  ;;  %v5473_v38 = vld [vmem:[%s7516_s1 + $0xe34] ss:$8 sps:$4 sm:$0xff]  }
 0x15b   :  { %3546 = vmatpush1.bf16.msra.mxu1 %v5388_v39  ;;  %v5468_v39 = vld [vmem:[%s7516_s1 + $0x630] ss:$8 sps:$4 sm:$0xff]  }
 0x15c   :  { %3874 = vmatpush1.bf16.msra.mxu0 %v5391_v35  ;;  %3547 = vmatprep.subr.bf16.mxu1 %v5396_v42  ;;  %v5471_v35 = vld [vmem:[%s7516_s1 + $0xe30] ss:$8 sps:$4 sm:$0xff]   ;;  %v5476_v42 = vld [vmem:[%s7516_s1 + $0x644] ss:$8 sps:$4 sm:$0xff]  }
 0x15d   :  { %3875 = vmatprep.subr.bf16.mxu0 %v5399_v44  ;;  %v5479_v44 = vld [vmem:[%s7516_s1 + $0xe44] ss:$8 sps:$4 sm:$0xff]  }
 0x15f   :  { %3548 = vmatpush1.bf16.msra.mxu1 %v5394_v45  ;;  %v5474_v45 = vld [vmem:[%s7516_s1 + $0x640] ss:$8 sps:$4 sm:$0xff]  }
 0x160   :  { %3876 = vmatpush1.bf16.msra.mxu0 %v5397_v46  ;;  %3549 = vmatprep.subr.bf16.mxu1 %v5402_v47  ;;  %v5477_v46 = vld [vmem:[%s7516_s1 + $0xe40] ss:$8 sps:$4 sm:$0xff]   ;;  %v5482_v47 = vld [vmem:[%s7516_s1 + $0x654] ss:$8 sps:$4 sm:$0xff]  }
 0x161   :  { %3877 = vmatprep.subr.bf16.mxu0 %v5405_v48  ;;  %v5485_v48 = vld [vmem:[%s7516_s1 + $0xe54] ss:$8 sps:$4 sm:$0xff]  }
 0x163   :  { %3550 = vmatpush1.bf16.msra.mxu1 %v5400_v52  ;;  %v5480_v52 = vld [vmem:[%s7516_s1 + $0x650] ss:$8 sps:$4 sm:$0xff]  }
 0x164   :  { %3878 = vmatpush1.bf16.msra.mxu0 %v5403_v53  ;;  %3551 = vmatprep.subr.bf16.mxu1 %v5408_v54  ;;  %v5483_v53 = vld [vmem:[%s7516_s1 + $0xe50] ss:$8 sps:$4 sm:$0xff]   ;;  %v5488_v54 = vld [vmem:[%s7516_s1 + $0x664] ss:$8 sps:$4 sm:$0xff]  }
 0x165   :  { %3879 = vmatprep.subr.bf16.mxu0 %v5411_v55  ;;  %v5491_v55 = vld [vmem:[%s7516_s1 + $0xe64] ss:$8 sps:$4 sm:$0xff]  }
 0x167   :  { %3552 = vmatpush1.bf16.msra.mxu1 %v5406_v15  ;;  %v5486_v15 = vld [vmem:[%s7516_s1 + $0x660] ss:$8 sps:$4 sm:$0xff]  }
 0x168   :  { %3880 = vmatpush1.bf16.msra.mxu0 %v5409_v40  ;;  %3553 = vmatprep.subr.bf16.mxu1 %v5414_v58  ;;  %v5489_v40 = vld [vmem:[%s7516_s1 + $0xe60] ss:$8 sps:$4 sm:$0xff]   ;;  %v5494_v58 = vld [vmem:[%s7516_s1 + $0x674] ss:$8 sps:$4 sm:$0xff]  }
 0x169   :  { %3881 = vmatprep.subr.bf16.mxu0 %v5417_v59  ;;  %v5497_v59 = vld [vmem:[%s7516_s1 + $0xe74] ss:$8 sps:$4 sm:$0xff]  }
 0x16b   :  { %3554 = vmatpush1.bf16.msra.mxu1 %v5412_v60  ;;  %v5492_v60 = vld [vmem:[%s7516_s1 + $0x670] ss:$8 sps:$4 sm:$0xff]  }
 0x16c   :  { %3882 = vmatpush1.bf16.msra.mxu0 %v5415_v61  ;;  %3555 = vmatprep.subr.bf16.mxu1 %v5420_v62  ;;  %v5495_v61 = vld [vmem:[%s7516_s1 + $0xe70] ss:$8 sps:$4 sm:$0xff]   ;;  %v5500_v62 = vld [vmem:[%s7516_s1 + $0x684] ss:$8 sps:$4 sm:$0xff]  }
 0x16d   :  { %3883 = vmatprep.subr.bf16.mxu0 %v5423_v63  ;;  %v5503_v63 = vld [vmem:[%s7516_s1 + $0xe84] ss:$8 sps:$4 sm:$0xff]  }
 0x16f   :  { %3556 = vmatpush1.bf16.msra.mxu1 %v5418_v0  ;;  %v5498_v0 = vld [vmem:[%s7516_s1 + $0x680] ss:$8 sps:$4 sm:$0xff]  }
 0x170   :  { %3884 = vmatpush1.bf16.msra.mxu0 %v5421_v1  ;;  %3557 = vmatprep.subr.bf16.mxu1 %v5426_v2  ;;  %v5501_v1 = vld [vmem:[%s7516_s1 + $0xe80] ss:$8 sps:$4 sm:$0xff]   ;;  %v5506_v2 = vld [vmem:[%s7516_s1 + $0x694] ss:$8 sps:$4 sm:$0xff]  }
 0x171   :  { %3885 = vmatprep.subr.bf16.mxu0 %v5429_v36  ;;  %v5509_v36 = vld [vmem:[%s7516_s1 + $0xe94] ss:$8 sps:$4 sm:$0xff]  }
 0x173   :  { %3558 = vmatpush1.bf16.msra.mxu1 %v5424_v41  ;;  %v5504_v41 = vld [vmem:[%s7516_s1 + $0x690] ss:$8 sps:$4 sm:$0xff]  }
 0x174   :  { %3886 = vmatpush1.bf16.msra.mxu0 %v5427_v50  ;;  %3559 = vmatprep.subr.bf16.mxu1 %v5432_v4  ;;  %v5507_v50 = vld [vmem:[%s7516_s1 + $0xe90] ss:$8 sps:$4 sm:$0xff]   ;;  %v5512_v4 = vld [vmem:[%s7516_s1 + $0x6a4] ss:$8 sps:$4 sm:$0xff]  }
 0x175   :  { %3887 = vmatprep.subr.bf16.mxu0 %v5435_v5  ;;  %v5515_v5 = vld [vmem:[%s7516_s1 + $0xea4] ss:$8 sps:$4 sm:$0xff]  }
 0x177   :  { %3560 = vmatpush1.bf16.msra.mxu1 %v5430_v6  ;;  %v5510_v6 = vld [vmem:[%s7516_s1 + $0x6a0] ss:$8 sps:$4 sm:$0xff]  }
 0x178   :  { %3888 = vmatpush1.bf16.msra.mxu0 %v5433_v7  ;;  %3561 = vmatprep.subr.bf16.mxu1 %v5438_v8  ;;  %v5513_v7 = vld [vmem:[%s7516_s1 + $0xea0] ss:$8 sps:$4 sm:$0xff]   ;;  %v5518_v8 = vld [vmem:[%s7516_s1 + $0x6b4] ss:$8 sps:$4 sm:$0xff]  }
 0x179   :  { %3889 = vmatprep.subr.bf16.mxu0 %v5441_v9  ;;  %v5521_v9 = vld [vmem:[%s7516_s1 + $0xeb4] ss:$8 sps:$4 sm:$0xff]  }
 0x17b   :  { %3562 = vmatpush1.bf16.msra.mxu1 %v5436_v12  ;;  %v5516_v12 = vld [vmem:[%s7516_s1 + $0x6b0] ss:$8 sps:$4 sm:$0xff]  }
 0x17c   :  { %3890 = vmatpush1.bf16.msra.mxu0 %v5439_v13  ;;  %3563 = vmatprep.subr.bf16.mxu1 %v5444_v16  ;;  %v5519_v13 = vld [vmem:[%s7516_s1 + $0xeb0] ss:$8 sps:$4 sm:$0xff]   ;;  %v5524_v16 = vld [vmem:[%s7516_s1 + $0x6c4] ss:$8 sps:$4 sm:$0xff]  }
 0x17d   :  { %3891 = vmatprep.subr.bf16.mxu0 %v5447_v56  ;;  %v5527_v56 = vld [vmem:[%s7516_s1 + $0xec4] ss:$8 sps:$4 sm:$0xff]  }
 0x17f   :  { %3564 = vmatpush1.bf16.msra.mxu1 %v5442_v18  ;;  %v5522_v18 = vld [vmem:[%s7516_s1 + $0x6c0] ss:$8 sps:$4 sm:$0xff]  }
 0x180   :  { %3892 = vmatpush1.bf16.msra.mxu0 %v5445_v19  ;;  %3574 = vmatprep.subr.bf16.mxu1 %v5451_v20  ;;  %v5525_v19 = vld [vmem:[%s7516_s1 + $0xec0] ss:$8 sps:$4 sm:$0xff]   ;;  %v5530_v20 = vld [vmem:[%s7516_s1 + $0x6d4] ss:$8 sps:$4 sm:$0xff]  }
 0x181   :  { %3902 = vmatprep.subr.bf16.mxu0 %v5455_v21  ;;  %v5533_v21 = vld [vmem:[%s7516_s1 + $0xed4] ss:$8 sps:$4 sm:$0xff]  }
 0x182   :  { %3566 = vmatmul.mubr.bf16.vlgmr.msra.gmra.mrb[0].mxu1 %v222_v24  ;;  %v5536_v24 = vld [vmem:[%s7516_s1 + $0x6e4] ss:$8 sps:$4 sm:$0xff]  }
 0x183   :  { %3894 = vmatmul.mubr.bf16.vlgmr.msra.gmra.mrb[0].mxu0 %v238_v25  ;;  %3575 = vmatpush1.bf16.msra.mxu1 %v5449_v26  ;;  %v5539_v25 = vld [vmem:[%s7516_s1 + $0xee4] ss:$8 sps:$4 sm:$0xff]   ;;  %v95_v26 = vcombine.high %v6971_v10, %v6971_v10  ;;  %v5545_v10 = vld [vmem:[%s7516_s1 + $0xef4] ss:$8 sps:$4 sm:$0xff]  }
 0x184   :  { %3903 = vmatpush1.bf16.msra.mxu0 %v5453_v27  ;;  %3576 = vmatprep.subr.bf16.mxu1 %v5458_v28  ;;  %v163_v27 = vcombine.high %v6976_v11, %v6976_v11  ;;  %v5534_v28 = vld [vmem:[%s7516_s1 + $0x6e0] ss:$8 sps:$4 sm:$0xff]  }
 0x185   :  { %3904 = vmatprep.subr.bf16.mxu0 %v5461_v51  ;;  %3606 = vmatprep.mubr.bf16.mxu1 %v225_v3  ;;  %v5537_v51 = vld [vmem:[%s7516_s1 + $0xee0] ss:$8 sps:$4 sm:$0xff]   ;;  %v5542_v3 = vld [vmem:[%s7516_s1 + $0x6f4] ss:$8 sps:$4 sm:$0xff]   ;;  %v7203_v11 = vrot.slane %v95_v26, %v5852_v49  ;;  %v5615_v26 = vld [vmem:[%s7516_s1 + $0xfb0] ss:$8 sps:$4 sm:$0xff]  }
 0x186   :  { %3934 = vmatprep.mubr.bf16.mxu0 %v241_v29  ;;  %v7206_v29 = vrot.slane %v163_v27, %v5852_v49  ;;  %v5551_v49 = vld [vmem:[%s7516_s1 + $0xf04] ss:$8 sps:$4 sm:$0xff]  }
 0x187   :  { %3577 = vmatpush1.bf16.msra.mxu1 %v5456_v30  ;;  %v5540_v30 = vld [vmem:[%s7516_s1 + $0x6f0] ss:$8 sps:$4 sm:$0xff]   ;;  %v5620_v27 = vld [vmem:[%s7516_s1 + $0x7c4] ss:$8 sps:$4 sm:$0xff]  }
 0x188   :  { %3905 = vmatpush1.bf16.msra.mxu0 %v5459_v31  ;;  %3578 = vmatprep.subr.bf16.mxu1 %v5464_v32  ;;  %v5543_v31 = vld [vmem:[%s7516_s1 + $0xef0] ss:$8 sps:$4 sm:$0xff]   ;;  %v5548_v32 = vld [vmem:[%s7516_s1 + $0x704] ss:$8 sps:$4 sm:$0xff]  }
 0x189   :  { %3906 = vmatprep.subr.bf16.mxu0 %v5467_v33  ;;  %v111_v33 = vcombine.high %v7203_v11, %v7203_v11 }
 0x18b   :  { %3579 = vmatpush1.bf16.msra.mxu1 %v5462_v34  ;;  %v179_v34 = vcombine.high %v7206_v29, %v7206_v29 }
 0x18c   :  { %3907 = vmatpush1.bf16.msra.mxu0 %v5465_v14  ;;  %3580 = vmatprep.subr.bf16.mxu1 %v5470_v37  ;;  %v224_v14 = vpack.c.bf16 %v6992_v57, %v6992_v57  ;;  %v240_v37 = vpack.c.bf16 %v6996_v17, %v6996_v17  ;;  %v5557_v57 = vld [vmem:[%s7516_s1 + $0xf14] ss:$8 sps:$4 sm:$0xff]   ;;  %v227_v17 = vpack.c.bf16 %v111_v33, %v111_v33  ;;  %v5635_v33 = vld [vmem:[%s7516_s1 + $0xfe4] ss:$8 sps:$4 sm:$0xff]  }
 0x18d   :  { %3908 = vmatprep.subr.bf16.mxu0 %v5473_v38  ;;  %v5546_v38 = vld [vmem:[%s7516_s1 + $0x700] ss:$8 sps:$4 sm:$0xff]  }
 0x18f   :  { %3581 = vmatpush1.bf16.msra.mxu1 %v5468_v39  ;;  %v5549_v39 = vld [vmem:[%s7516_s1 + $0xf00] ss:$8 sps:$4 sm:$0xff]  }
 0x190   :  { %3909 = vmatpush1.bf16.msra.mxu0 %v5471_v35  ;;  %3582 = vmatprep.subr.bf16.mxu1 %v5476_v42  ;;  %v5554_v35 = vld [vmem:[%s7516_s1 + $0x714] ss:$8 sps:$4 sm:$0xff]   ;;  %v243_v42 = vpack.c.bf16 %v179_v34, %v179_v34  ;;  %v5630_v34 = vld [vmem:[%s7516_s1 + $0x7e0] ss:$8 sps:$4 sm:$0xff]  }
 0x191   :  { %3910 = vmatprep.subr.bf16.mxu0 %v5479_v44  ;;  %v5552_v44 = vld [vmem:[%s7516_s1 + $0x710] ss:$8 sps:$4 sm:$0xff]  }
 0x193   :  { %3583 = vmatpush1.bf16.msra.mxu1 %v5474_v45  ;;  %v5555_v45 = vld [vmem:[%s7516_s1 + $0xf10] ss:$8 sps:$4 sm:$0xff]  }
 0x194   :  { %3911 = vmatpush1.bf16.msra.mxu0 %v5477_v46  ;;  %3584 = vmatprep.subr.bf16.mxu1 %v5482_v47  ;;  %v5560_v46 = vld [vmem:[%s7516_s1 + $0x724] ss:$8 sps:$4 sm:$0xff]  }
 0x195   :  { %3912 = vmatprep.subr.bf16.mxu0 %v5485_v48  ;;  %v5563_v47 = vld [vmem:[%s7516_s1 + $0xf24] ss:$8 sps:$4 sm:$0xff]   ;;  %v5558_v48 = vld [vmem:[%s7516_s1 + $0x720] ss:$8 sps:$4 sm:$0xff]  }
 0x197   :  { %3585 = vmatpush1.bf16.msra.mxu1 %v5480_v52  ;;  %v5561_v52 = vld [vmem:[%s7516_s1 + $0xf20] ss:$8 sps:$4 sm:$0xff]  }
 0x198   :  { %3913 = vmatpush1.bf16.msra.mxu0 %v5483_v53  ;;  %3586 = vmatprep.subr.bf16.mxu1 %v5488_v54  ;;  %v5566_v53 = vld [vmem:[%s7516_s1 + $0x734] ss:$8 sps:$4 sm:$0xff]  }
 0x199   :  { %3914 = vmatprep.subr.bf16.mxu0 %v5491_v55  ;;  %v5569_v54 = vld [vmem:[%s7516_s1 + $0xf34] ss:$8 sps:$4 sm:$0xff]   ;;  %v5564_v55 = vld [vmem:[%s7516_s1 + $0x730] ss:$8 sps:$4 sm:$0xff]  }
 0x19b   :  { %3587 = vmatpush1.bf16.msra.mxu1 %v5486_v15  ;;  %v5567_v15 = vld [vmem:[%s7516_s1 + $0xf30] ss:$8 sps:$4 sm:$0xff]  }
 0x19c   :  { %3915 = vmatpush1.bf16.msra.mxu0 %v5489_v40  ;;  %3588 = vmatprep.subr.bf16.mxu1 %v5494_v58  ;;  %v5572_v40 = vld [vmem:[%s7516_s1 + $0x744] ss:$8 sps:$4 sm:$0xff]  }
 0x19d   :  { %3916 = vmatprep.subr.bf16.mxu0 %v5497_v59  ;;  %v5575_v58 = vld [vmem:[%s7516_s1 + $0xf44] ss:$8 sps:$4 sm:$0xff]   ;;  %v5570_v59 = vld [vmem:[%s7516_s1 + $0x740] ss:$8 sps:$4 sm:$0xff]  }
 0x19f   :  { %3589 = vmatpush1.bf16.msra.mxu1 %v5492_v60  ;;  %v5573_v60 = vld [vmem:[%s7516_s1 + $0xf40] ss:$8 sps:$4 sm:$0xff]  }
 0x1a0   :  { %3917 = vmatpush1.bf16.msra.mxu0 %v5495_v61  ;;  %3590 = vmatprep.subr.bf16.mxu1 %v5500_v62  ;;  %v5578_v61 = vld [vmem:[%s7516_s1 + $0x754] ss:$8 sps:$4 sm:$0xff]  }
 0x1a1   :  { %3918 = vmatprep.subr.bf16.mxu0 %v5503_v63  ;;  %v5581_v62 = vld [vmem:[%s7516_s1 + $0xf54] ss:$8 sps:$4 sm:$0xff]   ;;  %v5576_v63 = vld [vmem:[%s7516_s1 + $0x750] ss:$8 sps:$4 sm:$0xff]  }
 0x1a3   :  { %3591 = vmatpush1.bf16.msra.mxu1 %v5498_v0  ;;  %v5579_v0 = vld [vmem:[%s7516_s1 + $0xf50] ss:$8 sps:$4 sm:$0xff]  }
 0x1a4   :  { %3919 = vmatpush1.bf16.msra.mxu0 %v5501_v1  ;;  %3592 = vmatprep.subr.bf16.mxu1 %v5506_v2  ;;  %v5584_v1 = vld [vmem:[%s7516_s1 + $0x764] ss:$8 sps:$4 sm:$0xff]  }
 0x1a5   :  { %3920 = vmatprep.subr.bf16.mxu0 %v5509_v36  ;;  %v5587_v2 = vld [vmem:[%s7516_s1 + $0xf64] ss:$8 sps:$4 sm:$0xff]   ;;  %v5582_v36 = vld [vmem:[%s7516_s1 + $0x760] ss:$8 sps:$4 sm:$0xff]  }
 0x1a7   :  { %3593 = vmatpush1.bf16.msra.mxu1 %v5504_v41  ;;  %v5585_v41 = vld [vmem:[%s7516_s1 + $0xf60] ss:$8 sps:$4 sm:$0xff]  }
 0x1a8   :  { %3921 = vmatpush1.bf16.msra.mxu0 %v5507_v50  ;;  %3594 = vmatprep.subr.bf16.mxu1 %v5512_v4  ;;  %v5590_v50 = vld [vmem:[%s7516_s1 + $0x774] ss:$8 sps:$4 sm:$0xff]  }
 0x1a9   :  { %3922 = vmatprep.subr.bf16.mxu0 %v5515_v5  ;;  %v5593_v4 = vld [vmem:[%s7516_s1 + $0xf74] ss:$8 sps:$4 sm:$0xff]   ;;  %v5588_v5 = vld [vmem:[%s7516_s1 + $0x770] ss:$8 sps:$4 sm:$0xff]  }
 0x1ab   :  { %3595 = vmatpush1.bf16.msra.mxu1 %v5510_v6  ;;  %v5591_v6 = vld [vmem:[%s7516_s1 + $0xf70] ss:$8 sps:$4 sm:$0xff]  }
 0x1ac   :  { %3923 = vmatpush1.bf16.msra.mxu0 %v5513_v7  ;;  %3596 = vmatprep.subr.bf16.mxu1 %v5518_v8  ;;  %v5596_v7 = vld [vmem:[%s7516_s1 + $0x784] ss:$8 sps:$4 sm:$0xff]  }
 0x1ad   :  { %3924 = vmatprep.subr.bf16.mxu0 %v5521_v9  ;;  %v5599_v8 = vld [vmem:[%s7516_s1 + $0xf84] ss:$8 sps:$4 sm:$0xff]   ;;  %v5594_v9 = vld [vmem:[%s7516_s1 + $0x780] ss:$8 sps:$4 sm:$0xff]  }
 0x1af   :  { %3597 = vmatpush1.bf16.msra.mxu1 %v5516_v12  ;;  %v5597_v12 = vld [vmem:[%s7516_s1 + $0xf80] ss:$8 sps:$4 sm:$0xff]  }
 0x1b0   :  { %3925 = vmatpush1.bf16.msra.mxu0 %v5519_v13  ;;  %3598 = vmatprep.subr.bf16.mxu1 %v5524_v16  ;;  %v5602_v13 = vld [vmem:[%s7516_s1 + $0x794] ss:$8 sps:$4 sm:$0xff]  }
 0x1b1   :  { %3926 = vmatprep.subr.bf16.mxu0 %v5527_v56  ;;  %v5605_v16 = vld [vmem:[%s7516_s1 + $0xf94] ss:$8 sps:$4 sm:$0xff]   ;;  %v5600_v56 = vld [vmem:[%s7516_s1 + $0x790] ss:$8 sps:$4 sm:$0xff]  }
 0x1b3   :  { %3599 = vmatpush1.bf16.msra.mxu1 %v5522_v18  ;;  %v5603_v18 = vld [vmem:[%s7516_s1 + $0xf90] ss:$8 sps:$4 sm:$0xff]  }
 0x1b4   :  { %3927 = vmatpush1.bf16.msra.mxu0 %v5525_v19  ;;  %3600 = vmatprep.subr.bf16.mxu1 %v5530_v20  ;;  %v5608_v19 = vld [vmem:[%s7516_s1 + $0x7a4] ss:$8 sps:$4 sm:$0xff]  }
 0x1b5   :  { %3928 = vmatprep.subr.bf16.mxu0 %v5533_v21  ;;  %v5611_v20 = vld [vmem:[%s7516_s1 + $0xfa4] ss:$8 sps:$4 sm:$0xff]   ;;  %v5606_v21 = vld [vmem:[%s7516_s1 + $0x7a0] ss:$8 sps:$4 sm:$0xff]  }
 0x1b7   :  { %3601 = vmatpush1.bf16.msra.mxu1 %v5528_v22  ;;  %v5609_v22 = vld [vmem:[%s7516_s1 + $0xfa0] ss:$8 sps:$4 sm:$0xff]  }
 0x1b8   :  { %3929 = vmatpush1.bf16.msra.mxu0 %v5531_v23  ;;  %3602 = vmatprep.subr.bf16.mxu1 %v5536_v24  ;;  %v5614_v23 = vld [vmem:[%s7516_s1 + $0x7b4] ss:$8 sps:$4 sm:$0xff]  }
 0x1b9   :  { %3930 = vmatprep.subr.bf16.mxu0 %v5539_v25  ;;  %v5617_v24 = vld [vmem:[%s7516_s1 + $0xfb4] ss:$8 sps:$4 sm:$0xff]   ;;  %v5612_v25 = vld [vmem:[%s7516_s1 + $0x7b0] ss:$8 sps:$4 sm:$0xff]  }
 0x1bb   :  { %3603 = vmatpush1.bf16.msra.mxu1 %v5534_v28  ;;  %v5623_v28 = vld [vmem:[%s7516_s1 + $0xfc4] ss:$8 sps:$4 sm:$0xff]  }
 0x1bc   :  { %3931 = vmatpush1.bf16.msra.mxu0 %v5537_v51  ;;  %3604 = vmatprep.subr.bf16.mxu1 %v5542_v3  ;;  %v5618_v51 = vld [vmem:[%s7516_s1 + $0x7c0] ss:$8 sps:$4 sm:$0xff]  }
 0x1bd   :  { %3932 = vmatprep.subr.bf16.mxu0 %v5545_v10  ;;  %v5621_v3 = vld [vmem:[%s7516_s1 + $0xfc0] ss:$8 sps:$4 sm:$0xff]   ;;  %v5626_v10 = vld [vmem:[%s7516_s1 + $0x7d4] ss:$8 sps:$4 sm:$0xff]  }
 0x1bf   :  { %3605 = vmatpush1.bf16.msra.mxu1 %v5540_v30  ;;  %v5629_v30 = vld [vmem:[%s7516_s1 + $0xfd4] ss:$8 sps:$4 sm:$0xff]  }
 0x1c0   :  { %3933 = vmatpush1.bf16.msra.mxu0 %v5543_v31  ;;  %3615 = vmatprep.subr.bf16.mxu1 %v5548_v32  ;;  %v5624_v31 = vld [vmem:[%s7516_s1 + $0x7d0] ss:$8 sps:$4 sm:$0xff]  }
 0x1c1   :  { %3943 = vmatprep.subr.bf16.mxu0 %v5551_v49  ;;  %v5627_v32 = vld [vmem:[%s7516_s1 + $0xfd0] ss:$8 sps:$4 sm:$0xff]   ;;  %v5632_v49 = vld [vmem:[%s7516_s1 + $0x7e4] ss:$8 sps:$4 sm:$0xff]  }
 0x1c2   :  { %3607 = vmatmul.mubr.bf16.vlgmr.msra.gmra.mrb[0].mxu1 %v224_v14  ;;  %v5633_v14 = vld [vmem:[%s7516_s1 + $0xfe0] ss:$8 sps:$4 sm:$0xff]  }
 0x1c3   :  { %3935 = vmatmul.mubr.bf16.vlgmr.msra.gmra.mrb[0].mxu0 %v240_v37  ;;  %3616 = vmatpush1.bf16.msra.mxu1 %v5546_v38  ;;  %v5638_v37 = vld [vmem:[%s7516_s1 + $0x7f4] ss:$8 sps:$4 sm:$0xff]  }
 0x1c4   :  { %3944 = vmatpush1.bf16.msra.mxu0 %v5549_v39  ;;  %3617 = vmatprep.subr.bf16.mxu1 %v5554_v35  ;;  %v5641_v38 = vld [vmem:[%s7516_s1 + $0xff4] ss:$8 sps:$4 sm:$0xff]   ;;  %v5636_v39 = vld [vmem:[%s7516_s1 + $0x7f0] ss:$8 sps:$4 sm:$0xff]  }
 0x1c5   :  { %3945 = vmatprep.subr.bf16.mxu0 %v5557_v57  ;;  %3647 = vmatprep.mubr.bf16.mxu1 %v227_v17  ;;  %v5639_v35 = vld [vmem:[%s7516_s1 + $0xff0] ss:$8 sps:$4 sm:$0xff]   ;;  %v226_v57 = vpack.c.bf16 %v7203_v11, %v7203_v11  ;;  %v242_v17 = vpack.c.bf16 %v7206_v29, %v7206_v29  ;;  %v756_v11 = vld [vmem:[%s7519_s2] sm:$0x3]  ;;  %v764_v29 = vsub.s32 1, %v5834_v43 }
 0x1c6   :  { %3975 = vmatprep.mubr.bf16.mxu0 %v243_v42  ;;  %v4005_v42 = vld [vmem:[%s7518_s3 + $0x8] sm:$0xff] }
 0x1c7   :  { %3618 = vmatpush1.bf16.msra.mxu1 %v5552_v44  ;;  %v4007_v44 = vld [vmem:[%s7518_s3 + $0x18] sm:$0xff] }
 0x1c8   :  { %3946 = vmatpush1.bf16.msra.mxu0 %v5555_v45  ;;  %3619 = vmatprep.subr.bf16.mxu1 %v5560_v46  ;;  %v4775_v45 = vpack.c.bf16 %v4007_v44, %v4005_v42  ;;  %v760_v46 = vsub.s32 0, %v5834_v43  ;;  %v4129_v44 = vld [vmem:[%s7521_s5 + $0x10] sm:$0xff] }
 0x1c9   :  { %3947 = vmatprep.subr.bf16.mxu0 %v5563_v47 }
 0x1ca   :  { %v761_v47 = vrot.slane %v756_v11, %v760_v46 }
 0x1cb   :  { %3620 = vmatpush1.bf16.msra.mxu1 %v5558_v48  ;;  %v765_v48 = vrot.slane %v756_v11, %v764_v29  ;;  %v4131_v11 = vld [vmem:[%s7521_s5 + $0x20] sm:$0xff] }
 0x1cc   :  { %3948 = vmatpush1.bf16.msra.mxu0 %v5561_v52  ;;  %3621 = vmatprep.subr.bf16.mxu1 %v5566_v53 }
 0x1cd   :  { %3949 = vmatprep.subr.bf16.mxu0 %v5569_v54  ;;  %v4004_v54 = vld [vmem:[%s7518_s3] sm:$0xff] }
 0x1cf   :  { %3622 = vmatpush1.bf16.msra.mxu1 %v5564_v55  ;;  %v4006_v55 = vld [vmem:[%s7518_s3 + $0x10] sm:$0xff] }
 0x1d0   :  { %3950 = vmatpush1.bf16.msra.mxu0 %v5567_v15  ;;  %3623 = vmatprep.subr.bf16.mxu1 %v5572_v40 }
 0x1d1   :  { %3951 = vmatprep.subr.bf16.mxu0 %v5575_v58 }
 0x1d3   :  { %3624 = vmatpush1.bf16.msra.mxu1 %v5570_v59  ;;  %v4777_v59 = vpack.c.bf16 %v4006_v55, %v4004_v54 }
 0x1d4   :  { %3952 = vmatpush1.bf16.msra.mxu0 %v5573_v60  ;;  %3625 = vmatprep.subr.bf16.mxu1 %v5578_v61 }
 0x1d5   :  { %3953 = vmatprep.subr.bf16.mxu0 %v5581_v62 }
 0x1d7   :  { %3626 = vmatpush1.bf16.msra.mxu1 %v5576_v63 }
 0x1d8   :  { %3954 = vmatpush1.bf16.msra.mxu0 %v5579_v0  ;;  %3627 = vmatprep.subr.bf16.mxu1 %v5584_v1 }
 0x1d9   :  { %3955 = vmatprep.subr.bf16.mxu0 %v5587_v2  ;;  %v4009_v2 = vld [vmem:[%s7518_s3 + $0x28] sm:$0xff] }
 0x1db   :  { %3628 = vmatpush1.bf16.msra.mxu1 %v5582_v36  ;;  %v4011_v36 = vld [vmem:[%s7518_s3 + $0x38] sm:$0xff] }
 0x1dc   :  { %3956 = vmatpush1.bf16.msra.mxu0 %v5585_v41  ;;  %3629 = vmatprep.subr.bf16.mxu1 %v5590_v50  ;;  %v4779_v50 = vpack.c.bf16 %v4011_v36, %v4009_v2 }
 0x1dd   :  { %3957 = vmatprep.subr.bf16.mxu0 %v5593_v4  ;;  %v4008_v4 = vld [vmem:[%s7518_s3 + $0x20] sm:$0xff] }
 0x1df   :  { %3630 = vmatpush1.bf16.msra.mxu1 %v5588_v5  ;;  %v4010_v5 = vld [vmem:[%s7518_s3 + $0x30] sm:$0xff] }
 0x1e0   :  { %3958 = vmatpush1.bf16.msra.mxu0 %v5591_v6  ;;  %3631 = vmatprep.subr.bf16.mxu1 %v5596_v7  ;;  %v4781_v6 = vpack.c.bf16 %v4010_v5, %v4008_v4  ;;  %v4013_v7 = vld [vmem:[%s7518_s3 + $0x48] sm:$0xff] }
 0x1e1   :  { %3959 = vmatprep.subr.bf16.mxu0 %v5599_v8  ;;  %v4015_v8 = vld [vmem:[%s7518_s3 + $0x58] sm:$0xff] }
 0x1e3   :  { %3632 = vmatpush1.bf16.msra.mxu1 %v5594_v9  ;;  %v4012_v9 = vld [vmem:[%s7518_s3 + $0x40] sm:$0xff] }
 0x1e4   :  { %3960 = vmatpush1.bf16.msra.mxu0 %v5597_v12  ;;  %3633 = vmatprep.subr.bf16.mxu1 %v5602_v13  ;;  %v4783_v12 = vpack.c.bf16 %v4015_v8, %v4013_v7  ;;  %v4014_v13 = vld [vmem:[%s7518_s3 + $0x50] sm:$0xff] }
 0x1e5   :  { %3961 = vmatprep.subr.bf16.mxu0 %v5605_v16  ;;  %v4017_v16 = vld [vmem:[%s7518_s3 + $0x68] sm:$0xff] }
 0x1e7   :  { %3634 = vmatpush1.bf16.msra.mxu1 %v5600_v56  ;;  %v4019_v56 = vld [vmem:[%s7518_s3 + $0x78] sm:$0xff] }
 0x1e8   :  { %3962 = vmatpush1.bf16.msra.mxu0 %v5603_v18  ;;  %3635 = vmatprep.subr.bf16.mxu1 %v5608_v19  ;;  %v5673_v18 = vmov 0.0   ;;  %v4785_v19 = vpack.c.bf16 %v4014_v13, %v4012_v9 }
 0x1e9   :  { %3963 = vmatprep.subr.bf16.mxu0 %v5611_v20  ;;  %v4787_v20 = vpack.c.bf16 %v4019_v56, %v4017_v16 }
 0x1eb   :  { %3636 = vmatpush1.bf16.msra.mxu1 %v5606_v21  ;;  %v4016_v21 = vld [vmem:[%s7518_s3 + $0x60] sm:$0xff] }
 0x1ec   :  { %3964 = vmatpush1.bf16.msra.mxu0 %v5609_v22  ;;  %3637 = vmatprep.subr.bf16.mxu1 %v5614_v23  ;;  %v4018_v22 = vld [vmem:[%s7518_s3 + $0x70] sm:$0xff] }
 0x1ed   :  { %3965 = vmatprep.subr.bf16.mxu0 %v5617_v24  ;;  %v4789_v23 = vpack.c.bf16 %v4018_v22, %v4016_v21 }
 0x1ef   :  { %3638 = vmatpush1.bf16.msra.mxu1 %v5612_v25 }
 0x1f0   :  { %3966 = vmatpush1.bf16.msra.mxu0 %v5615_v26  ;;  %3639 = vmatprep.subr.bf16.mxu1 %v5620_v27 }
 0x1f1   :  { %3967 = vmatprep.subr.bf16.mxu0 %v5623_v28 }
 0x1f3   :  { %3640 = vmatpush1.bf16.msra.mxu1 %v5618_v51 }
 0x1f4   :  { %3968 = vmatpush1.bf16.msra.mxu0 %v5621_v3  ;;  %3641 = vmatprep.subr.bf16.mxu1 %v5626_v10 }
 0x1f5   :  { %3969 = vmatprep.subr.bf16.mxu0 %v5629_v30 }
 0x1f7   :  { %3642 = vmatpush1.bf16.msra.mxu1 %v5624_v31 }
 0x1f8   :  { %3970 = vmatpush1.bf16.msra.mxu0 %v5627_v32  ;;  %3643 = vmatprep.subr.bf16.mxu1 %v5632_v49 }
 0x1f9   :  { %3971 = vmatprep.subr.bf16.mxu0 %v5635_v33 }
 0x1fb   :  { %3644 = vmatpush1.bf16.msra.mxu1 %v5630_v34  ;;  %v5675_v34 = vmov 0.0|0.0  }
 0x1fc   :  { %3972 = vmatpush1.bf16.msra.mxu0 %v5633_v14  ;;  %3645 = vmatprep.subr.bf16.mxu1 %v5638_v37  ;;  %v4020_v14 = vld [vmem:[%s7520_s4] sm:$0x3] }
 0x1fd   :  { %3973 = vmatprep.subr.bf16.mxu0 %v5641_v38  ;;  %v4025_v37 = vrot.slane %v4020_v14, %v760_v46  ;;  %v4127_v38 = vld [vmem:[%s7521_s5] sm:$0xff] }
 0x1ff   :  { %3646 = vmatpush1.bf16.msra.mxu1 %v5636_v39  ;;  %v4128_v39 = vld [vmem:[%s7521_s5 + $0x8] sm:$0xff] }
 0x200   :  { %3974 = vmatpush1.bf16.msra.mxu0 %v5639_v35  ;;  %4791 = vmatprep.subr.bf16.mxu1 %v5675_v34  ;;  %v4792_v35 = vpack.c.bf16 %v4128_v39, %v4127_v38 }
 0x201   :  { %4776 = vmatprep.subr.bf16.mxu0 %v4775_v45  ;;  %v4130_v45 = vld [vmem:[%s7521_s5 + $0x18] sm:$0xff] }
 0x202   :  { %3648 = vmatmul.mubr.bf16.vlgmr.msra.gmra.mrb[0].mxu1 %v226_v57  ;;  %v4795_v46 = vpack.c.bf16 %v4130_v45, %v4129_v44 }
 0x203   :  { %3976 = vmatmul.mubr.bf16.vlgmr.msra.gmra.mrb[0].mxu0 %v242_v17  ;;  %4793 = vmatpush3.bf16.msra.mxu1 %v4792_v35 }
 0x204   :  { %4778 = vmatpush1.bf16.msra.mxu0 %v4777_v59  ;;  %4100 = vmatprep.mubr.f32.mxu0 %v5673_v18 }
 0x205   :  { %4780 = vmatprep.subr.bf16.mxu0 %v4779_v50  ;;  %4794 = vmatprep.subr.bf16.mxu1 %v5675_v34 }
 0x206   :  { %4772 = vmatprep.mubr.msk.f32.mxu1 %vm5676_vm1, %v5673_v18 }
 0x207   :  { %4796 = vmatpush3.bf16.msra.mxu1 %v4795_v46 }
 0x208   :  { %4782 = vmatpush1.bf16.msra.mxu0 %v4781_v6  ;;  %4797 = vmatprep.subr.bf16.mxu1 %v5675_v34 }
 0x209   :  { %4784 = vmatprep.subr.bf16.mxu0 %v4783_v12 }
 0x20c   :  { %4786 = vmatpush1.bf16.msra.mxu0 %v4785_v19 }
 0x20d   :  { %4788 = vmatprep.subr.bf16.mxu0 %v4787_v20 }
 0x210   :  { %4790 = vmatpush1.bf16.msra.mxu0 %v4789_v23 }
 0x2d5   :  { %v3649_v52 = vpop.f32.mrb[0].mxu1 }
 0x2d6   :  { %v3977_v53 = vpop.f32.mrb[0].mxu0  ;;  %v4803_v15 = vadd.f32 %v3649_v52, %v761_v47  ;;  %v3651_v40 = vpop.f32.mrb[1].mxu1  ;;  %v4132_v47 = vld [vmem:[%s7521_s5 + $0x28] sm:$0xff]  ;;  %v4133_v52 = vld [vmem:[%s7521_s5 + $0x30] sm:$0xff] }
 0x2d7   :  { %v3979_v58 = vpop.f32.mrb[1].mxu0  ;;  %v4805_v60 = vadd.f32 %v3651_v40, %v765_v48  ;;  %v3653_v61 = vpop.f32.mrb[2].mxu1  ;;  %v4798_v48 = vpack.c.bf16 %v4132_v47, %v4131_v11 }
 0x2d8   :  { %v3981_v62 = vpop.f32.mrb[2].mxu0  ;;  %v4804_v63 = vadd.f32 %v4803_v15, %v3977_v53  ;;  %v3654_v0 = vpop.f32.mrb[3].mxu1  ;;  %v4134_v53 = vld [vmem:[%s7521_s5 + $0x38] sm:$0xff]  ;;  %v12_v15 = vstv %s7522_s6 }
 0x2d9   :  { %v3982_v1 = vpop.f32.mrb[3].mxu0  ;;  %v4806_v41 = vadd.f32 %v4805_v60, %v3979_v58  ;;  %4799 = vmatpush3.bf16.msra.mxu1 %v4798_v48  ;;  %v4801_v54 = vpack.c.bf16 %v4134_v53, %v4133_v52  ;;  %13 = vst [vmem:[#allocation2] sm:$0x1] %v12_v15  ;;  %v4029_v58 = vrot.slane %v4020_v14, %v764_v29 }
 0x2da   :  { %5644 = vtanh.f32 %v4804_v63  ;;  %v4739_v25 = vmul.f32 -1.442695, %v4804_v63  ;;  %4800 = vmatprep.subr.bf16.mxu1 %v5675_v34 }
 0x2db   :  { %v4740_v26 = vmul.f32 -1.442695, %v4806_v41 }
 0x2dc   :  { %5646 = vpow2.f32 %v4739_v25 }
 0x2dd   :  { %5648 = vpow2.f32 %v4740_v26  ;;  %4802 = vmatpush3.bf16.msra.mxu1 %v4801_v54 }
 0x2e0   :  { %v4744_v43 = vld [vmem:[#allocation2] ss:$0 sm:$0xff] }
 0x2e4   :  { %v5645_v24 = vpop.eup %5644 }
 0x2e5   :  { %3998 = vrot.lane.b32.xlu0 %v5645_v24, %s5674_s24 }
 0x2e6   :  { %v5647_v27 = vpop.eup %5646 }
 0x2e7   :  { %v3987_v28 = vadd.f32 1.0, %v5647_v27  ;;  %v5649_v51 = vpop.eup %5648 }
 0x2e8   :  { %v3994_v3 = vadd.f32 1.0, %v5649_v51 }
 0x2e9   :  { %5650 = vrcp.f32 %v3987_v28 }
 0x2ea   :  { %5652 = vrcp.f32 %v3994_v3 }
 0x2f3   :  { %v5651_v10 = vpop.eup %5650 }
 0x2f4   :  { %v5653_v32 = vpop.eup %5652 }
 0x357   :  { %v3999_v30 = vpop.permute.xlu0 %3998 }
 0x358   :  { %v4001_v31 = vmul.f32 %v5651_v10, %v3999_v30 }
 0x35a   :  { %5654 = vtanh.f32 %v4001_v31 }
 0x364   :  { %v5655_v49 = vpop.eup %5654 }
 0x365   :  { %v4003_v33 = vmul.f32 %v5655_v49, %v5653_v32 }
 0x367   :  { %4741 = vmatmul.mubr.msk.f32.vlgmr.msra.gmra.mrb[4].mxu0 %vm4032_vm0, %v4003_v33 }
 0x43a   :  { %v4102_v57 = vpop.f32.mrb[4].mxu0 }
 0x43b   :  { %v4103_v17 = vadd.f32 %v4102_v57, %v4025_v37  ;;  %v4104_v42 = vpop.f32.mrb[5].mxu0 }
 0x43c   :  { %v4105_v59 = vadd.f32 %v4104_v42, %v4029_v58 }
 0x43d   :  { %5656 = vtanh.f32 %v4103_v17  ;;  %v4742_v40 = vmul.f32 -1.442695, %v4103_v17 }
 0x43e   :  { %v4743_v60 = vmul.f32 -1.442695, %v4105_v59 }
 0x43f   :  { %5658 = vpow2.f32 %v4742_v40 }
 0x440   :  { %5660 = vpow2.f32 %v4743_v60 }
 0x447   :  { %v5657_v55 = vpop.eup %5656 }
 0x448   :  { %4121 = vrot.lane.b32.xlu0 %v5657_v55, %s5674_s24 }
 0x449   :  { %v5659_v61 = vpop.eup %5658 }
 0x44a   :  { %v4110_v62 = vadd.f32 1.0, %v5659_v61  ;;  %v5661_v63 = vpop.eup %5660 }
 0x44b   :  { %v4117_v0 = vadd.f32 1.0, %v5661_v63 }
 0x44c   :  { %5662 = vrcp.f32 %v4110_v62 }
 0x44d   :  { %5664 = vrcp.f32 %v4117_v0 }
 0x456   :  { %v5663_v1 = vpop.eup %5662 }
 0x457   :  { %v5665_v41 = vpop.eup %5664 }
 0x4ba   :  { %v4122_v2 = vpop.permute.xlu0 %4121 }
 0x4bb   :  { %v4124_v36 = vmul.f32 %v5663_v1, %v4122_v2 }
 0x4bd   :  { %5666 = vtanh.f32 %v4124_v36 }
 0x4c7   :  { %v5667_v50 = vpop.eup %5666 }
 0x4c8   :  { %v4126_v4 = vmul.f32 %v5667_v50, %v5665_v41 }
 0x4ca   :  { %4773 = vmatmul.mubr.msk.f32.vlgmr.msra.gmra.mrb[4].mxu1 %vm4032_vm0, %v4126_v4 }
 0x59d   :  { %v4211_v29 = vpop.f32.mrb[4].mxu1 }
 0x59e   :  { %v4212_v5 = vadd.f32 %v4744_v43, %v4211_v29  ;;  %v4774_v6 = vpop.f32.mrb[5].mxu1 }
 0x5a0   :  { %v4746_v7 = vmul.f32 -1.442695, %v4212_v5 }
 0x5a2   :  { %5668 = vpow2.f32 %v4746_v7 }
 0x5ac   :  { %v5669_v8 = vpop.eup %5668 }
 0x5ad   :  { %v4218_v9 = vadd.f32 1.0, %v5669_v8 }
 0x5af   :  { %5670 = vrcp.f32 %v4218_v9 }
 0x5b9   :  { %v5671_v12 = vpop.eup %5670 }
 0x5ba   :  { %4222 = vst.msk [vmem:[%s7523_s7] sm:$0x3] %vm4221_vm2, %v5671_v12 }

</bundles_post_ra>
